<compile_context>
chip_gen: v6e
topology: v6e:2x2x1
jax: 0.10.0
libtpu: 0.0.40
codegen_flags: <defaults>
</compile_context>

<pallas_src>
import math

import jax
import jax.numpy as jnp
import numpy as np
from jax import lax
from jax.experimental import pallas as pl
from jax.experimental.pallas import tpu as pltpu

# ----- small XLNet-like config -----
S = 8            # qlen
K = 8            # klen (no mems -> klen == qlen)
R = S + K        # rlen of relative position embeddings
B = 2            # batch
H = 32           # d_model
NH = 4           # n_head
DH = 8           # d_head  (NH * DH == H)
DI = 64          # d_inner
EPS = 1e-12      # layer_norm_eps
SCALE = 1.0 / math.sqrt(DH)


# ----- helpers usable both inside the kernel and in the JAX reference -----
def _layer_norm(x, w, b):
    mu = jnp.mean(x, axis=-1, keepdims=True)
    var = jnp.mean((x - mu) ** 2, axis=-1, keepdims=True)
    return (x - mu) * lax.rsqrt(var + EPS) * w + b


def _gelu(x):
    # OpenAI-GPT gelu used by XLNet
    return 0.5 * x * (1.0 + jnp.tanh(math.sqrt(2.0 / math.pi)
                                     * (x + 0.044715 * x ** 3)))


# ----- Pallas kernel: one batch-chunk per grid step (grid_b=1 -> whole batch) -----
def xlnet_layer_kernel(h_ref, r_ref, negmask_ref, seg0_ref, seg1_ref, sel_ref,
                       wqkv_ref, wr_ref, rwb_ref, rrb_ref, rsb_ref,
                       segemb_ref, wo_ref, ln1_ref,
                       w1_ref, b1_ref, w2_ref, b2_ref, ln2_ref,
                       out_ref):
    bc, s, hdim = h_ref.shape          # batch chunk, qlen, d_model
    rlen = r_ref.shape[1]
    klen = negmask_ref.shape[2]        # == s (no mems)
    nh, _, dh = wr_ref.shape
    bs = bc * s
    nb = nh * bc                       # head-batched leading dim (n-major)
    scale = 1.0 / math.sqrt(dh)

    h2 = h_ref[...].reshape(bs, hdim)              # (bs, H)
    r2 = r_ref[...].reshape(bc * rlen, hdim)       # (bc*R, H)

    # --- fused per-head Q/K/V projection, heads as a dot_general batch dim ---
    h_nh = jnp.broadcast_to(h2[None], (nh, bs, hdim))
    qkv = jnp.einsum('nbh,nhd->nbd', h_nh, wqkv_ref[...],
                     preferred_element_type=jnp.float32)        # (nh, bs, 3*dh)
    r_nh = jnp.broadcast_to(r2[None], (nh, bc * rlen, hdim))
    kr = jnp.einsum('nbh,nhd->nbd', r_nh, wr_ref[...],
                    preferred_element_type=jnp.float32)         # (nh, bc*R, dh)

    q = qkv[:, :, 0:dh]
    k = qkv[:, :, dh:2 * dh]
    v = qkv[:, :, 2 * dh:3 * dh]

    # hoisted relative-bias adds (three full-width adds, no per-head slices)
    q_rw = q + rwb_ref[...]                       # (nh, bs, dh)
    q_rr = q + rrb_ref[...]
    q_rs = q + rsb_ref[...]

    # segment term:  ef1[n, (b,i), t] = (q + r_s_bias) . seg_embed[t]
    ef1 = jnp.einsum('nbd,ntd->nbt', q_rs, segemb_ref[...],
                     preferred_element_type=jnp.float32)        # (nh, bs, 2)

    # reshape to head-batched (nb = nh*bc, rows, width) -- leading-dim reshapes only
    def heads_to_batch(x, rows, width):
        return x.reshape(nh, bc, rows, width).reshape(nb, rows, width)

    q_rw3 = heads_to_batch(q_rw, s, dh)
    q_rr3 = heads_to_batch(q_rr, s, dh)
    k3 = heads_to_batch(k, s, dh)                 # klen == qlen (no mems)
    v3 = heads_to_batch(v, s, dh)
    kr3 = heads_to_batch(kr, rlen, dh)
    ef13 = heads_to_batch(ef1, s, 2)

    # broadcast per-batch mask / segment indicators over heads (done once)
    negmask = jnp.broadcast_to(negmask_ref[...][None],
                               (nh, bc, s, klen)).reshape(nb, s, klen)
    seg0 = jnp.broadcast_to(seg0_ref[...][None],
                            (nh, bc, s, klen)).reshape(nb, s, klen)
    seg1 = jnp.broadcast_to(seg1_ref[...][None],
                            (nh, bc, s, klen)).reshape(nb, s, klen)

    # --- attention scores ---
    ac = jnp.einsum('nid,njd->nij', q_rw3, k3,
                    preferred_element_type=jnp.float32)         # (nb, s, klen)
    bd_full = jnp.einsum('nid,njd->nij', q_rr3, kr3,
                         preferred_element_type=jnp.float32)    # (nb, s, rlen)
    # rel_shift applied once to all heads: shifted[n,i,j] = bd_full[n,i,j+s-i]
    # (sel_ref is the host-precomputed one-hot selector, shape (s, klen, rlen))
    bd = jnp.sum(bd_full[:, :, None, :] * sel_ref[...][None, :, :, :],
                 axis=-1)                                       # (nb, s, klen)
    ef = seg0 * ef13[:, :, 0:1] + seg1 * ef13[:, :, 1:2]        # (nb, s, klen)

    score = (ac + bd + ef) * scale + negmask
    score = score - jnp.max(score, axis=-1, keepdims=True)
    p = jnp.exp(score)
    p = p * pl.reciprocal(jnp.sum(p, axis=-1, keepdims=True), approx=True)
    # attention dropout: identity (eval)

    attn_vec = jnp.einsum('nij,njd->nid', p, v3,
                          preferred_element_type=jnp.float32)   # (nb, s, dh)

    # --- output projection: one batched matmul + single reduction over heads ---
    av_nh = attn_vec.reshape(nh, bc, s, dh).reshape(nh, bs, dh)
    attn_out = jnp.einsum('nbd,ndh->nbh', av_nh, wo_ref[...],
                          preferred_element_type=jnp.float32)   # (nh, bs, H)
    attn_out = jnp.sum(attn_out, axis=0)                        # (bs, H)

    # post_attention: residual + layer norm
    x = _layer_norm(attn_out + h2, ln1_ref[0:1, :], ln1_ref[1:2, :])

    # XLNetFeedForward
    y = _gelu(jnp.dot(x, w1_ref[...],
                      preferred_element_type=jnp.float32) + b1_ref[...])
    z = jnp.dot(y, w2_ref[...],
                preferred_element_type=jnp.float32) + b2_ref[...]
    out = _layer_norm(z + x, ln2_ref[0:1, :], ln2_ref[1:2, :])

    out_ref[...] = out.reshape(bc, s, hdim)


# ----- wrapper -----
def xlnet_layer_pallas(params, output_h, attn_mask_h, r, seg_mat, grid_b=1):
    """grid_b=1: whole batch in one program (best on v5e/v6e, 1 TensorCore).
       grid_b=2: two parallel batch halves (maps onto v7x's 2 TensorCores)."""
    assert B % grid_b == 0
    Bc = B // grid_b

    h_b = jnp.transpose(output_h, (1, 0, 2))               # (B, S, H)
    r_b = jnp.transpose(r, (1, 0, 2))                      # (B, R, H)
    negmask_b = -1e30 * jnp.transpose(attn_mask_h, (2, 0, 1))   # (B, S, K)
    seg0_b = jnp.transpose(seg_mat[..., 0], (2, 0, 1))     # (B, S, K)
    seg1_b = jnp.transpose(seg_mat[..., 1], (2, 0, 1))     # (B, S, K)

    # host-precomputed rel_shift selector: sel[i, j, r] = (r == j + S - i)
    ii = jnp.arange(S)[:, None, None]
    jj = jnp.arange(K)[None, :, None]
    rr = jnp.arange(R)[None, None, :]
    shift_sel = (rr == jj + S - ii).astype(jnp.float32)    # (S, K, R)

    # packed per-head weights (all layout plumbing done on the host/XLA side)
    w_qkv = jnp.transpose(jnp.concatenate([params['q'], params['k'], params['v']],
                                          axis=-1), (1, 0, 2))   # (NH, H, 3*DH)
    w_r = jnp.transpose(params['r'], (1, 0, 2))                  # (NH, H, DH)
    wo_h = jnp.transpose(params['o'], (1, 2, 0))                 # (NH, DH, H)
    rwb = params['r_w_bias'].reshape(NH, 1, DH)
    rrb = params['r_r_bias'].reshape(NH, 1, DH)
    rsb = params['r_s_bias'].reshape(NH, 1, DH)
    segemb = jnp.transpose(params['seg_embed'], (1, 0, 2))       # (NH, 2, DH)
    ln1 = jnp.stack([params['ln1_w'], params['ln1_b']], axis=0)  # (2, H)
    ln2 = jnp.stack([params['ln2_w'], params['ln2_b']], axis=0)  # (2, H)
    w1 = params['ff_w1']
    b1 = params['ff_b1'].reshape(1, DI)
    w2 = params['ff_w2']
    b2 = params['ff_b2'].reshape(1, H)

    def chunk(a):
        return pl.BlockSpec((Bc,) + a.shape[1:],
                            lambda g, nd=a.ndim: (g,) + (0,) * (nd - 1))

    def full(a):
        return pl.BlockSpec(a.shape, lambda g, nd=a.ndim: (0,) * nd)

    out = pl.pallas_call(
        xlnet_layer_kernel,
        out_shape=jax.ShapeDtypeStruct((B, S, H), jnp.float32),
        grid=(grid_b,),
        in_specs=[chunk(h_b), chunk(r_b), chunk(negmask_b),
                  chunk(seg0_b), chunk(seg1_b), full(shift_sel),
                  full(w_qkv), full(w_r), full(rwb), full(rrb), full(rsb),
                  full(segemb), full(wo_h), full(ln1),
                  full(w1), full(b1), full(w2), full(b2), full(ln2)],
        out_specs=pl.BlockSpec((Bc, S, H), lambda g: (g, 0, 0)),
        compiler_params=pltpu.CompilerParams(
            dimension_semantics=("parallel",)),
    )(h_b, r_b, negmask_b, seg0_b, seg1_b, shift_sel,
      w_qkv, w_r, rwb, rrb, rsb, segemb, wo_h, ln1, w1, b1, w2, b2, ln2)

    return jnp.transpose(out, (1, 0, 2)), None     # (output_h, output_g=None)


# ----- pure-JAX reference (mirrors the torch code) -----
def _rel_shift_ref(x, klen):
    I, J, Bb, N = x.shape
    x = x.reshape(J, I, Bb, N)
    x = x[1:]
    x = x.reshape(I, J - 1, Bb, N)
    return x[:, :klen]


def xlnet_layer_ref(params, h, attn_mask, r, seg_mat):
    q_head = jnp.einsum('ibh,hnd->ibnd', h, params['q'])
    k_head = jnp.einsum('ibh,hnd->ibnd', h, params['k'])
    v_head = jnp.einsum('ibh,hnd->ibnd', h, params['v'])
    k_r = jnp.einsum('ibh,hnd->ibnd', r, params['r'])

    ac = jnp.einsum('ibnd,jbnd->ijbn', q_head + params['r_w_bias'], k_head)
    bd = jnp.einsum('ibnd,jbnd->ijbn', q_head + params['r_r_bias'], k_r)
    bd = _rel_shift_ref(bd, klen=ac.shape[1])
    ef = jnp.einsum('ibnd,snd->ibns', q_head + params['r_s_bias'],
                    params['seg_embed'])
    ef = jnp.einsum('ijbs,ibns->ijbn', seg_mat, ef)

    score = (ac + bd + ef) * SCALE - 1e30 * attn_mask[..., None]
    prob = jax.nn.softmax(score, axis=1)
    attn_vec = jnp.einsum('ijbn,jbnd->ibnd', prob, v_head)
    attn_out = jnp.einsum('ibnd,hnd->ibh', attn_vec, params['o'])
    x = _layer_norm(attn_out + h, params['ln1_w'], params['ln1_b'])

    y = _gelu(x @ params['ff_w1'] + params['ff_b1'])
    z = y @ params['ff_w2'] + params['ff_b2']
    return _layer_norm(z + x, params['ln2_w'], params['ln2_b'])


# ----- deterministic parameter init -----
def make_params(key):
    ks = jax.random.split(key, 16)

    def init(k, shape, scale=0.02):
        return (scale * jax.random.normal(k, shape)).astype(jnp.float32)

    return dict(
        q=init(ks[0], (H, NH, DH)),
        k=init(ks[1], (H, NH, DH)),
        v=init(ks[2], (H, NH, DH)),
        o=init(ks[3], (H, NH, DH)),
        r=init(ks[4], (H, NH, DH)),
        r_w_bias=init(ks[5], (NH, DH)),
        r_r_bias=init(ks[6], (NH, DH)),
        r_s_bias=init(ks[7], (NH, DH)),
        seg_embed=init(ks[8], (2, NH, DH)),
        ln1_w=jnp.ones((H,), jnp.float32) + init(ks[9], (H,)),
        ln1_b=init(ks[10], (H,)),
        ff_w1=init(ks[11], (H, DI)),
        ff_b1=init(ks[12], (DI,)),
        ff_w2=init(ks[13], (DI, H)),
        ff_b2=init(ks[14], (H,)),
        ln2_w=jnp.ones((H,), jnp.float32) + init(ks[15], (H,)),
        ln2_b=jnp.zeros((H,), jnp.float32),
    )


if __name__ == "__main__":
    key = jax.random.PRNGKey(0)
    kp, kh, kr, ks = jax.random.split(key, 4)
    params = make_params(kp)

    h = jax.random.normal(kh, (S, B, H), jnp.float32)          # output_h
    r = jax.random.normal(kr, (R, B, H), jnp.float32)          # rel pos emb
    seg_ids = jax.random.bernoulli(ks, 0.5, (S, B)).astype(jnp.int32)
    diff = (seg_ids[:, None, :] != seg_ids[None, :, :]).astype(jnp.int32)   # (S,K,B)
    seg_mat = jax.nn.one_hot(diff, 2, dtype=jnp.float32)                    # (S,K,B,2)
    causal = (jnp.arange(K)[None, :] > jnp.arange(S)[:, None]).astype(jnp.float32)
    attn_mask_h = jnp.broadcast_to(causal[:, :, None], (S, K, B))           # 1.0 = masked

    ref = xlnet_layer_ref(params, h, attn_mask_h, r, seg_mat)

    # default path: batch folded into a single program (v5e / v6e)
    out_h, out_g = xlnet_layer_pallas(params, h, attn_mask_h, r, seg_mat, grid_b=1)
    out_h = jax.block_until_ready(out_h)
    np.testing.assert_allclose(np.asarray(out_h), np.asarray(ref),
                               rtol=2e-2, atol=2e-2)

    # v7x path: 2-wide parallel grid (one batch half per TensorCore)
    out_h2, _ = xlnet_layer_pallas(params, h, attn_mask_h, r, seg_mat, grid_b=2)
    out_h2 = jax.block_until_ready(out_h2)
    np.testing.assert_allclose(np.asarray(out_h2), np.asarray(ref),
                               rtol=2e-2, atol=2e-2)

    print("KERNEL_OK")
</pallas_src>

<mosaic_0001>
module attributes {stable_mosaic.version = 11 : i64} {
  func.func @xlnet_layer_kernel(%arg0: i32, %arg1: memref<2x8x32xf32, #tpu.memory_space<vmem>>, %arg2: memref<2x16x32xf32, #tpu.memory_space<vmem>>, %arg3: memref<2x8x8xf32, #tpu.memory_space<vmem>>, %arg4: memref<2x8x8xf32, #tpu.memory_space<vmem>>, %arg5: memref<2x8x8xf32, #tpu.memory_space<vmem>>, %arg6: memref<8x8x16xf32, #tpu.memory_space<vmem>>, %arg7: memref<4x32x24xf32, #tpu.memory_space<vmem>>, %arg8: memref<4x32x8xf32, #tpu.memory_space<vmem>>, %arg9: memref<4x1x8xf32, #tpu.memory_space<vmem>>, %arg10: memref<4x1x8xf32, #tpu.memory_space<vmem>>, %arg11: memref<4x1x8xf32, #tpu.memory_space<vmem>>, %arg12: memref<4x2x8xf32, #tpu.memory_space<vmem>>, %arg13: memref<4x8x32xf32, #tpu.memory_space<vmem>>, %arg14: memref<2x32xf32, #tpu.memory_space<vmem>>, %arg15: memref<32x64xf32, #tpu.memory_space<vmem>>, %arg16: memref<1x64xf32, #tpu.memory_space<vmem>>, %arg17: memref<64x32xf32, #tpu.memory_space<vmem>>, %arg18: memref<1x32xf32, #tpu.memory_space<vmem>>, %arg19: memref<2x32xf32, #tpu.memory_space<vmem>>, %arg20: memref<2x8x32xf32, #tpu.memory_space<vmem>>) attributes {dimension_semantics = [#tpu.dimension_semantics<parallel>], iteration_bounds = array<i64: 1>, scalar_prefetch = 0 : i64, scratch_operands = 0 : i64, tpu.core_type = #tpu.core_type<tc>, window_params = [{transform_indices = @transform_0, window_bounds = array<i64: 2, 8, 32>}, {transform_indices = @transform_1, window_bounds = array<i64: 2, 16, 32>}, {transform_indices = @transform_2, window_bounds = array<i64: 2, 8, 8>}, {transform_indices = @transform_3, window_bounds = array<i64: 2, 8, 8>}, {transform_indices = @transform_4, window_bounds = array<i64: 2, 8, 8>}, {pipeline_mode = #tpu.pipeline_mode<synchronous>, transform_indices = @transform_5, window_bounds = array<i64: 8, 8, 16>}, {pipeline_mode = #tpu.pipeline_mode<synchronous>, transform_indices = @transform_6, window_bounds = array<i64: 4, 32, 24>}, {pipeline_mode = #tpu.pipeline_mode<synchronous>, transform_indices = @transform_7, window_bounds = array<i64: 4, 32, 8>}, {pipeline_mode = #tpu.pipeline_mode<synchronous>, transform_indices = @transform_8, window_bounds = array<i64: 4, 1, 8>}, {pipeline_mode = #tpu.pipeline_mode<synchronous>, transform_indices = @transform_9, window_bounds = array<i64: 4, 1, 8>}, {pipeline_mode = #tpu.pipeline_mode<synchronous>, transform_indices = @transform_10, window_bounds = array<i64: 4, 1, 8>}, {pipeline_mode = #tpu.pipeline_mode<synchronous>, transform_indices = @transform_11, window_bounds = array<i64: 4, 2, 8>}, {pipeline_mode = #tpu.pipeline_mode<synchronous>, transform_indices = @transform_12, window_bounds = array<i64: 4, 8, 32>}, {pipeline_mode = #tpu.pipeline_mode<synchronous>, transform_indices = @transform_13, window_bounds = array<i64: 2, 32>}, {pipeline_mode = #tpu.pipeline_mode<synchronous>, transform_indices = @transform_14, window_bounds = array<i64: 32, 64>}, {pipeline_mode = #tpu.pipeline_mode<synchronous>, transform_indices = @transform_15, window_bounds = array<i64: 1, 64>}, {pipeline_mode = #tpu.pipeline_mode<synchronous>, transform_indices = @transform_16, window_bounds = array<i64: 64, 32>}, {pipeline_mode = #tpu.pipeline_mode<synchronous>, transform_indices = @transform_17, window_bounds = array<i64: 1, 32>}, {pipeline_mode = #tpu.pipeline_mode<synchronous>, transform_indices = @transform_18, window_bounds = array<i64: 2, 32>}, {transform_indices = @transform_19, window_bounds = array<i64: 2, 8, 32>}]} {
    %c0 = arith.constant 0 : index
    %c0_0 = arith.constant 0 : index
    %c0_1 = arith.constant 0 : index
    %0 = vector.load %arg1[%c0, %c0_0, %c0_1] : memref<2x8x32xf32, #tpu.memory_space<vmem>>, vector<2x8x32xf32>
    %1 = vector.shape_cast %0 : vector<2x8x32xf32> to vector<16x32xf32>
    %c0_2 = arith.constant 0 : index
    %c0_3 = arith.constant 0 : index
    %c0_4 = arith.constant 0 : index
    %2 = vector.load %arg2[%c0_2, %c0_3, %c0_4] : memref<2x16x32xf32, #tpu.memory_space<vmem>>, vector<2x16x32xf32>
    %3 = vector.shape_cast %2 : vector<2x16x32xf32> to vector<32x32xf32>
    %4 = vector.shape_cast %1 : vector<16x32xf32> to vector<1x16x32xf32>
    %5 = vector.shape_cast %4 : vector<1x16x32xf32> to vector<1x16x32xf32>
    %6 = vector.broadcast %5 : vector<1x16x32xf32> to vector<4x16x32xf32>
    %c0_5 = arith.constant 0 : index
    %c0_6 = arith.constant 0 : index
    %c0_7 = arith.constant 0 : index
    %7 = vector.load %arg7[%c0_5, %c0_6, %c0_7] : memref<4x32x24xf32, #tpu.memory_space<vmem>>, vector<4x32x24xf32>
    "tpu.trace_start"() <{level = 10 : i32, message = "nbh,nhd->nbd"}> : () -> ()
    %cst = arith.constant dense<0.000000e+00> : vector<4x16x24xf32>
    %8 = tpu.matmul %6, %7, %cst {dimension_numbers = #tpu.dot_dimension_numbers<[2], [1], [1], [2], [0, 0, 0, 1, 1, 2], [0], [0]>} : vector<4x16x32xf32>, vector<4x32x24xf32>, vector<4x16x24xf32> -> vector<4x16x24xf32>
    "tpu.trace_stop"() : () -> ()
    %9 = vector.shape_cast %3 : vector<32x32xf32> to vector<1x32x32xf32>
    %10 = vector.shape_cast %9 : vector<1x32x32xf32> to vector<1x32x32xf32>
    %11 = vector.broadcast %10 : vector<1x32x32xf32> to vector<4x32x32xf32>
    %c0_8 = arith.constant 0 : index
    %c0_9 = arith.constant 0 : index
    %c0_10 = arith.constant 0 : index
    %12 = vector.load %arg8[%c0_8, %c0_9, %c0_10] : memref<4x32x8xf32, #tpu.memory_space<vmem>>, vector<4x32x8xf32>
    "tpu.trace_start"() <{level = 10 : i32, message = "nbh,nhd->nbd"}> : () -> ()
    %cst_11 = arith.constant dense<0.000000e+00> : vector<4x32x8xf32>
    %13 = tpu.matmul %11, %12, %cst_11 {dimension_numbers = #tpu.dot_dimension_numbers<[2], [1], [1], [2], [0, 0, 0, 1, 1, 2], [0], [0]>} : vector<4x32x32xf32>, vector<4x32x8xf32>, vector<4x32x8xf32> -> vector<4x32x8xf32>
    "tpu.trace_stop"() : () -> ()
    %14 = vector.extract_strided_slice %8 {offsets = [0, 0, 0], sizes = [4, 16, 8], strides = [1, 1, 1]} : vector<4x16x24xf32> to vector<4x16x8xf32>
    %15 = vector.extract_strided_slice %8 {offsets = [0, 0, 8], sizes = [4, 16, 8], strides = [1, 1, 1]} : vector<4x16x24xf32> to vector<4x16x8xf32>
    %16 = vector.extract_strided_slice %8 {offsets = [0, 0, 16], sizes = [4, 16, 8], strides = [1, 1, 1]} : vector<4x16x24xf32> to vector<4x16x8xf32>
    %c0_12 = arith.constant 0 : index
    %c0_13 = arith.constant 0 : index
    %c0_14 = arith.constant 0 : index
    %17 = vector.load %arg9[%c0_12, %c0_13, %c0_14] : memref<4x1x8xf32, #tpu.memory_space<vmem>>, vector<4x1x8xf32>
    %18 = vector.broadcast %17 : vector<4x1x8xf32> to vector<4x16x8xf32>
    %19 = arith.addf %14, %18 : vector<4x16x8xf32>
    %c0_15 = arith.constant 0 : index
    %c0_16 = arith.constant 0 : index
    %c0_17 = arith.constant 0 : index
    %20 = vector.load %arg10[%c0_15, %c0_16, %c0_17] : memref<4x1x8xf32, #tpu.memory_space<vmem>>, vector<4x1x8xf32>
    %21 = vector.broadcast %20 : vector<4x1x8xf32> to vector<4x16x8xf32>
    %22 = arith.addf %14, %21 : vector<4x16x8xf32>
    %c0_18 = arith.constant 0 : index
    %c0_19 = arith.constant 0 : index
    %c0_20 = arith.constant 0 : index
    %23 = vector.load %arg11[%c0_18, %c0_19, %c0_20] : memref<4x1x8xf32, #tpu.memory_space<vmem>>, vector<4x1x8xf32>
    %24 = vector.broadcast %23 : vector<4x1x8xf32> to vector<4x16x8xf32>
    %25 = arith.addf %14, %24 : vector<4x16x8xf32>
    %c0_21 = arith.constant 0 : index
    %c0_22 = arith.constant 0 : index
    %c0_23 = arith.constant 0 : index
    %26 = vector.load %arg12[%c0_21, %c0_22, %c0_23] : memref<4x2x8xf32, #tpu.memory_space<vmem>>, vector<4x2x8xf32>
    "tpu.trace_start"() <{level = 10 : i32, message = "nbd,ntd->nbt"}> : () -> ()
    %cst_24 = arith.constant dense<0.000000e+00> : vector<4x16x2xf32>
    %27 = tpu.matmul %25, %26, %cst_24 {dimension_numbers = #tpu.dot_dimension_numbers<[2], [2], [1], [1], [0, 0, 0, 1, 1, 1], [0], [0]>} : vector<4x16x8xf32>, vector<4x2x8xf32>, vector<4x16x2xf32> -> vector<4x16x2xf32>
    "tpu.trace_stop"() : () -> ()
    %28 = vector.shape_cast %19 : vector<4x16x8xf32> to vector<4x2x8x8xf32>
    %29 = vector.shape_cast %28 : vector<4x2x8x8xf32> to vector<8x8x8xf32>
    %30 = vector.shape_cast %22 : vector<4x16x8xf32> to vector<4x2x8x8xf32>
    %31 = vector.shape_cast %30 : vector<4x2x8x8xf32> to vector<8x8x8xf32>
    %32 = vector.shape_cast %15 : vector<4x16x8xf32> to vector<4x2x8x8xf32>
    %33 = vector.shape_cast %32 : vector<4x2x8x8xf32> to vector<8x8x8xf32>
    %34 = vector.shape_cast %16 : vector<4x16x8xf32> to vector<4x2x8x8xf32>
    %35 = vector.shape_cast %34 : vector<4x2x8x8xf32> to vector<8x8x8xf32>
    %36 = vector.shape_cast %13 : vector<4x32x8xf32> to vector<4x2x16x8xf32>
    %37 = vector.shape_cast %36 : vector<4x2x16x8xf32> to vector<8x16x8xf32>
    %38 = vector.shape_cast %27 : vector<4x16x2xf32> to vector<4x2x8x2xf32>
    %39 = vector.shape_cast %38 : vector<4x2x8x2xf32> to vector<8x8x2xf32>
    %c0_25 = arith.constant 0 : index
    %c0_26 = arith.constant 0 : index
    %c0_27 = arith.constant 0 : index
    %40 = vector.load %arg3[%c0_25, %c0_26, %c0_27] : memref<2x8x8xf32, #tpu.memory_space<vmem>>, vector<2x8x8xf32>
    %41 = vector.shape_cast %40 : vector<2x8x8xf32> to vector<1x2x8x8xf32>
    %42 = vector.shape_cast %41 : vector<1x2x8x8xf32> to vector<1x2x8x8xf32>
    %43 = vector.broadcast %42 : vector<1x2x8x8xf32> to vector<4x2x8x8xf32>
    %44 = vector.shape_cast %43 : vector<4x2x8x8xf32> to vector<8x8x8xf32>
    %c0_28 = arith.constant 0 : index
    %c0_29 = arith.constant 0 : index
    %c0_30 = arith.constant 0 : index
    %45 = vector.load %arg4[%c0_28, %c0_29, %c0_30] : memref<2x8x8xf32, #tpu.memory_space<vmem>>, vector<2x8x8xf32>
    %46 = vector.shape_cast %45 : vector<2x8x8xf32> to vector<1x2x8x8xf32>
    %47 = vector.shape_cast %46 : vector<1x2x8x8xf32> to vector<1x2x8x8xf32>
    %48 = vector.broadcast %47 : vector<1x2x8x8xf32> to vector<4x2x8x8xf32>
    %49 = vector.shape_cast %48 : vector<4x2x8x8xf32> to vector<8x8x8xf32>
    %c0_31 = arith.constant 0 : index
    %c0_32 = arith.constant 0 : index
    %c0_33 = arith.constant 0 : index
    %50 = vector.load %arg5[%c0_31, %c0_32, %c0_33] : memref<2x8x8xf32, #tpu.memory_space<vmem>>, vector<2x8x8xf32>
    %51 = vector.shape_cast %50 : vector<2x8x8xf32> to vector<1x2x8x8xf32>
    %52 = vector.shape_cast %51 : vector<1x2x8x8xf32> to vector<1x2x8x8xf32>
    %53 = vector.broadcast %52 : vector<1x2x8x8xf32> to vector<4x2x8x8xf32>
    %54 = vector.shape_cast %53 : vector<4x2x8x8xf32> to vector<8x8x8xf32>
    "tpu.trace_start"() <{level = 10 : i32, message = "nid,njd->nij"}> : () -> ()
    %cst_34 = arith.constant dense<0.000000e+00> : vector<8x8x8xf32>
    %55 = tpu.matmul %29, %33, %cst_34 {dimension_numbers = #tpu.dot_dimension_numbers<[2], [2], [1], [1], [0, 0, 0, 1, 1, 1], [0], [0]>} : vector<8x8x8xf32>, vector<8x8x8xf32>, vector<8x8x8xf32> -> vector<8x8x8xf32>
    %cst_35 = arith.constant dense<0.000000e+00> : vector<8x8x16xf32>
    %56 = tpu.matmul %31, %37, %cst_35 {dimension_numbers = #tpu.dot_dimension_numbers<[2], [2], [1], [1], [0, 0, 0, 1, 1, 1], [0], [0]>} : vector<8x8x8xf32>, vector<8x16x8xf32>, vector<8x8x16xf32> -> vector<8x8x16xf32>
    "tpu.trace_stop"() : () -> ()
    %57 = vector.shape_cast %56 : vector<8x8x16xf32> to vector<8x8x1x16xf32>
    %c0_36 = arith.constant 0 : index
    %c0_37 = arith.constant 0 : index
    %c0_38 = arith.constant 0 : index
    %58 = vector.load %arg6[%c0_36, %c0_37, %c0_38] : memref<8x8x16xf32, #tpu.memory_space<vmem>>, vector<8x8x16xf32>
    %59 = vector.shape_cast %58 : vector<8x8x16xf32> to vector<1x8x8x16xf32>
    %60 = vector.broadcast %57 : vector<8x8x1x16xf32> to vector<8x8x8x16xf32>
    %61 = vector.broadcast %59 : vector<1x8x8x16xf32> to vector<8x8x8x16xf32>
    %62 = arith.mulf %60, %61 : vector<8x8x8x16xf32>
    %cst_39 = arith.constant dense<0.000000e+00> : vector<8x8x8xf32>
    %63 = vector.multi_reduction <add>, %62, %cst_39 [3] : vector<8x8x8x16xf32> to vector<8x8x8xf32>
    %64 = vector.extract_strided_slice %39 {offsets = [0, 0, 0], sizes = [8, 8, 1], strides = [1, 1, 1]} : vector<8x8x2xf32> to vector<8x8x1xf32>
    %65 = vector.broadcast %64 : vector<8x8x1xf32> to vector<8x8x8xf32>
    %66 = arith.mulf %49, %65 : vector<8x8x8xf32>
    %67 = vector.extract_strided_slice %39 {offsets = [0, 0, 1], sizes = [8, 8, 1], strides = [1, 1, 1]} : vector<8x8x2xf32> to vector<8x8x1xf32>
    %68 = vector.broadcast %67 : vector<8x8x1xf32> to vector<8x8x8xf32>
    %69 = arith.mulf %54, %68 : vector<8x8x8xf32>
    %70 = arith.addf %66, %69 : vector<8x8x8xf32>
    %71 = arith.addf %55, %63 : vector<8x8x8xf32>
    %72 = arith.addf %71, %70 : vector<8x8x8xf32>
    %cst_40 = arith.constant 0.353553385 : f32
    %73 = vector.broadcast %cst_40 : f32 to vector<8x8x8xf32>
    %74 = arith.mulf %72, %73 : vector<8x8x8xf32>
    %75 = arith.addf %74, %44 : vector<8x8x8xf32>
    %cst_41 = arith.constant dense<0xFF800000> : vector<8x8xf32>
    %76 = vector.multi_reduction <maximumf>, %75, %cst_41 [2] : vector<8x8x8xf32> to vector<8x8xf32>
    %77 = vector.shape_cast %76 : vector<8x8xf32> to vector<8x8x1xf32>
    %78 = vector.broadcast %77 : vector<8x8x1xf32> to vector<8x8x8xf32>
    %79 = arith.subf %75, %78 : vector<8x8x8xf32>
    %80 = math.exp %79 : vector<8x8x8xf32>
    %cst_42 = arith.constant dense<0.000000e+00> : vector<8x8xf32>
    %81 = vector.multi_reduction <add>, %80, %cst_42 [2] : vector<8x8x8xf32> to vector<8x8xf32>
    %82 = vector.shape_cast %81 : vector<8x8xf32> to vector<8x8x1xf32>
    %83 = tpu.reciprocal %82 {approx = true} : vector<8x8x1xf32> -> vector<8x8x1xf32>
    %84 = vector.broadcast %83 : vector<8x8x1xf32> to vector<8x8x8xf32>
    %85 = arith.mulf %80, %84 : vector<8x8x8xf32>
    "tpu.trace_start"() <{level = 10 : i32, message = "nij,njd->nid"}> : () -> ()
    %cst_43 = arith.constant dense<0.000000e+00> : vector<8x8x8xf32>
    %86 = tpu.matmul %85, %35, %cst_43 {dimension_numbers = #tpu.dot_dimension_numbers<[2], [1], [1], [2], [0, 0, 0, 1, 1, 2], [0], [0]>} : vector<8x8x8xf32>, vector<8x8x8xf32>, vector<8x8x8xf32> -> vector<8x8x8xf32>
    "tpu.trace_stop"() : () -> ()
    %87 = vector.shape_cast %86 : vector<8x8x8xf32> to vector<4x2x8x8xf32>
    %88 = vector.shape_cast %87 : vector<4x2x8x8xf32> to vector<4x16x8xf32>
    %c0_44 = arith.constant 0 : index
    %c0_45 = arith.constant 0 : index
    %c0_46 = arith.constant 0 : index
    %89 = vector.load %arg13[%c0_44, %c0_45, %c0_46] : memref<4x8x32xf32, #tpu.memory_space<vmem>>, vector<4x8x32xf32>
    "tpu.trace_start"() <{level = 10 : i32, message = "nbd,ndh->nbh"}> : () -> ()
    %cst_47 = arith.constant dense<0.000000e+00> : vector<4x16x32xf32>
    %90 = tpu.matmul %88, %89, %cst_47 {dimension_numbers = #tpu.dot_dimension_numbers<[2], [1], [1], [2], [0, 0, 0, 1, 1, 2], [0], [0]>} : vector<4x16x8xf32>, vector<4x8x32xf32>, vector<4x16x32xf32> -> vector<4x16x32xf32>
    "tpu.trace_stop"() : () -> ()
    %cst_48 = arith.constant dense<0.000000e+00> : vector<16x32xf32>
    %91 = vector.multi_reduction <add>, %90, %cst_48 [0] : vector<4x16x32xf32> to vector<16x32xf32>
    %92 = arith.addf %91, %1 : vector<16x32xf32>
    %c0_49 = arith.constant 0 : index
    %c0_50 = arith.constant 0 : index
    %93 = vector.load %arg14[%c0_49, %c0_50] : memref<2x32xf32, #tpu.memory_space<vmem>>, vector<1x32xf32>
    %c1 = arith.constant 1 : index
    %c0_51 = arith.constant 0 : index
    %94 = vector.load %arg14[%c1, %c0_51] : memref<2x32xf32, #tpu.memory_space<vmem>>, vector<1x32xf32>
    %cst_52 = arith.constant dense<0.000000e+00> : vector<16xf32>
    %95 = vector.multi_reduction <add>, %92, %cst_52 [1] : vector<16x32xf32> to vector<16xf32>
    %96 = vector.shape_cast %95 : vector<16xf32> to vector<16x1xf32>
    %cst_53 = arith.constant 3.200000e+01 : f32
    %97 = vector.broadcast %cst_53 : f32 to vector<16x1xf32>
    %98 = arith.divf %96, %97 : vector<16x1xf32>
    %99 = vector.broadcast %98 : vector<16x1xf32> to vector<16x32xf32>
    %100 = arith.subf %92, %99 : vector<16x32xf32>
    %101 = arith.mulf %100, %100 : vector<16x32xf32>
    %cst_54 = arith.constant dense<0.000000e+00> : vector<16xf32>
    %102 = vector.multi_reduction <add>, %101, %cst_54 [1] : vector<16x32xf32> to vector<16xf32>
    %103 = vector.shape_cast %102 : vector<16xf32> to vector<16x1xf32>
    %cst_55 = arith.constant 3.200000e+01 : f32
    %104 = vector.broadcast %cst_55 : f32 to vector<16x1xf32>
    %105 = arith.divf %103, %104 : vector<16x1xf32>
    %106 = vector.broadcast %98 : vector<16x1xf32> to vector<16x32xf32>
    %107 = arith.subf %92, %106 : vector<16x32xf32>
    %cst_56 = arith.constant 9.99999996E-13 : f32
    %108 = vector.broadcast %cst_56 : f32 to vector<16x1xf32>
    %109 = arith.addf %105, %108 : vector<16x1xf32>
    %110 = math.rsqrt %109 : vector<16x1xf32>
    %111 = vector.broadcast %110 : vector<16x1xf32> to vector<16x32xf32>
    %112 = arith.mulf %107, %111 : vector<16x32xf32>
    %113 = vector.broadcast %93 : vector<1x32xf32> to vector<16x32xf32>
    %114 = arith.mulf %112, %113 : vector<16x32xf32>
    %115 = vector.broadcast %94 : vector<1x32xf32> to vector<16x32xf32>
    %116 = arith.addf %114, %115 : vector<16x32xf32>
    %c0_57 = arith.constant 0 : index
    %c0_58 = arith.constant 0 : index
    %117 = vector.load %arg15[%c0_57, %c0_58] : memref<32x64xf32, #tpu.memory_space<vmem>>, vector<32x64xf32>
    %cst_59 = arith.constant dense<0.000000e+00> : vector<16x64xf32>
    %118 = tpu.matmul %116, %117, %cst_59 {dimension_numbers = #tpu.dot_dimension_numbers<[1], [0], [0], [1], [0, 0, 1, 1], [], []>} : vector<16x32xf32>, vector<32x64xf32>, vector<16x64xf32> -> vector<16x64xf32>
    %c0_60 = arith.constant 0 : index
    %c0_61 = arith.constant 0 : index
    %119 = vector.load %arg16[%c0_60, %c0_61] : memref<1x64xf32, #tpu.memory_space<vmem>>, vector<1x64xf32>
    %120 = vector.broadcast %119 : vector<1x64xf32> to vector<16x64xf32>
    %121 = arith.addf %118, %120 : vector<16x64xf32>
    %cst_62 = arith.constant 5.000000e-01 : f32
    %122 = vector.broadcast %cst_62 : f32 to vector<16x64xf32>
    %123 = arith.mulf %122, %121 : vector<16x64xf32>
    %124 = arith.mulf %121, %121 : vector<16x64xf32>
    %125 = arith.mulf %121, %124 : vector<16x64xf32>
    %cst_63 = arith.constant 4.471500e-02 : f32
    %126 = vector.broadcast %cst_63 : f32 to vector<16x64xf32>
    %127 = arith.mulf %126, %125 : vector<16x64xf32>
    %128 = arith.addf %121, %127 : vector<16x64xf32>
    %cst_64 = arith.constant 0.797884583 : f32
    %129 = vector.broadcast %cst_64 : f32 to vector<16x64xf32>
    %130 = arith.mulf %129, %128 : vector<16x64xf32>
    %131 = math.tanh %130 : vector<16x64xf32>
    %cst_65 = arith.constant 1.000000e+00 : f32
    %132 = vector.broadcast %cst_65 : f32 to vector<16x64xf32>
    %133 = arith.addf %132, %131 : vector<16x64xf32>
    %134 = arith.mulf %123, %133 : vector<16x64xf32>
    %c0_66 = arith.constant 0 : index
    %c0_67 = arith.constant 0 : index
    %135 = vector.load %arg17[%c0_66, %c0_67] : memref<64x32xf32, #tpu.memory_space<vmem>>, vector<64x32xf32>
    %cst_68 = arith.constant dense<0.000000e+00> : vector<16x32xf32>
    %136 = tpu.matmul %134, %135, %cst_68 {dimension_numbers = #tpu.dot_dimension_numbers<[1], [0], [0], [1], [0, 0, 1, 1], [], []>} : vector<16x64xf32>, vector<64x32xf32>, vector<16x32xf32> -> vector<16x32xf32>
    %c0_69 = arith.constant 0 : index
    %c0_70 = arith.constant 0 : index
    %137 = vector.load %arg18[%c0_69, %c0_70] : memref<1x32xf32, #tpu.memory_space<vmem>>, vector<1x32xf32>
    %138 = vector.broadcast %137 : vector<1x32xf32> to vector<16x32xf32>
    %139 = arith.addf %136, %138 : vector<16x32xf32>
    %140 = arith.addf %139, %116 : vector<16x32xf32>
    %c0_71 = arith.constant 0 : index
    %c0_72 = arith.constant 0 : index
    %141 = vector.load %arg19[%c0_71, %c0_72] : memref<2x32xf32, #tpu.memory_space<vmem>>, vector<1x32xf32>
    %c1_73 = arith.constant 1 : index
    %c0_74 = arith.constant 0 : index
    %142 = vector.load %arg19[%c1_73, %c0_74] : memref<2x32xf32, #tpu.memory_space<vmem>>, vector<1x32xf32>
    %cst_75 = arith.constant dense<0.000000e+00> : vector<16xf32>
    %143 = vector.multi_reduction <add>, %140, %cst_75 [1] : vector<16x32xf32> to vector<16xf32>
    %144 = vector.shape_cast %143 : vector<16xf32> to vector<16x1xf32>
    %cst_76 = arith.constant 3.200000e+01 : f32
    %145 = vector.broadcast %cst_76 : f32 to vector<16x1xf32>
    %146 = arith.divf %144, %145 : vector<16x1xf32>
    %147 = vector.broadcast %146 : vector<16x1xf32> to vector<16x32xf32>
    %148 = arith.subf %140, %147 : vector<16x32xf32>
    %149 = arith.mulf %148, %148 : vector<16x32xf32>
    %cst_77 = arith.constant dense<0.000000e+00> : vector<16xf32>
    %150 = vector.multi_reduction <add>, %149, %cst_77 [1] : vector<16x32xf32> to vector<16xf32>
    %151 = vector.shape_cast %150 : vector<16xf32> to vector<16x1xf32>
    %cst_78 = arith.constant 3.200000e+01 : f32
    %152 = vector.broadcast %cst_78 : f32 to vector<16x1xf32>
    %153 = arith.divf %151, %152 : vector<16x1xf32>
    %154 = vector.broadcast %146 : vector<16x1xf32> to vector<16x32xf32>
    %155 = arith.subf %140, %154 : vector<16x32xf32>
    %cst_79 = arith.constant 9.99999996E-13 : f32
    %156 = vector.broadcast %cst_79 : f32 to vector<16x1xf32>
    %157 = arith.addf %153, %156 : vector<16x1xf32>
    %158 = math.rsqrt %157 : vector<16x1xf32>
    %159 = vector.broadcast %158 : vector<16x1xf32> to vector<16x32xf32>
    %160 = arith.mulf %155, %159 : vector<16x32xf32>
    %161 = vector.broadcast %141 : vector<1x32xf32> to vector<16x32xf32>
    %162 = arith.mulf %160, %161 : vector<16x32xf32>
    %163 = vector.broadcast %142 : vector<1x32xf32> to vector<16x32xf32>
    %164 = arith.addf %162, %163 : vector<16x32xf32>
    %165 = vector.shape_cast %164 : vector<16x32xf32> to vector<2x8x32xf32>
    %c0_80 = arith.constant 0 : index
    %c0_81 = arith.constant 0 : index
    %c0_82 = arith.constant 0 : index
    %166 = vector.load %arg20[%c0_80, %c0_81, %c0_82] : memref<2x8x32xf32, #tpu.memory_space<vmem>>, vector<2x8x32xf32>
    tpu.vector_store %arg20[%c0_80, %c0_81, %c0_82], %165 {strides = array<i32>} : memref<2x8x32xf32, #tpu.memory_space<vmem>>, vector<2x8x32xf32>,
    return
  }
  func.func @transform_0(%arg0: i32) -> (i32, i32, i32) {
    %c0_i32 = arith.constant 0 : i32
    %c0_i32_0 = arith.constant 0 : i32
    %c0_i32_1 = arith.constant 0 : i32
    return %arg0, %c0_i32, %c0_i32_0 : i32, i32, i32
  }
  func.func @transform_1(%arg0: i32) -> (i32, i32, i32) {
    %c0_i32 = arith.constant 0 : i32
    %c0_i32_0 = arith.constant 0 : i32
    %c0_i32_1 = arith.constant 0 : i32
    return %arg0, %c0_i32, %c0_i32_0 : i32, i32, i32
  }
  func.func @transform_2(%arg0: i32) -> (i32, i32, i32) {
    %c0_i32 = arith.constant 0 : i32
    %c0_i32_0 = arith.constant 0 : i32
    %c0_i32_1 = arith.constant 0 : i32
    return %arg0, %c0_i32, %c0_i32_0 : i32, i32, i32
  }
  func.func @transform_3(%arg0: i32) -> (i32, i32, i32) {
    %c0_i32 = arith.constant 0 : i32
    %c0_i32_0 = arith.constant 0 : i32
    %c0_i32_1 = arith.constant 0 : i32
    return %arg0, %c0_i32, %c0_i32_0 : i32, i32, i32
  }
  func.func @transform_4(%arg0: i32) -> (i32, i32, i32) {
    %c0_i32 = arith.constant 0 : i32
    %c0_i32_0 = arith.constant 0 : i32
    %c0_i32_1 = arith.constant 0 : i32
    return %arg0, %c0_i32, %c0_i32_0 : i32, i32, i32
  }
  func.func @transform_5(%arg0: i32) -> (i32, i32, i32) {
    %c0_i32 = arith.constant 0 : i32
    %c0_i32_0 = arith.constant 0 : i32
    %c0_i32_1 = arith.constant 0 : i32
    %c0_i32_2 = arith.constant 0 : i32
    return %c0_i32, %c0_i32_0, %c0_i32_1 : i32, i32, i32
  }
  func.func @transform_6(%arg0: i32) -> (i32, i32, i32) {
    %c0_i32 = arith.constant 0 : i32
    %c0_i32_0 = arith.constant 0 : i32
    %c0_i32_1 = arith.constant 0 : i32
    %c0_i32_2 = arith.constant 0 : i32
    return %c0_i32, %c0_i32_0, %c0_i32_1 : i32, i32, i32
  }
  func.func @transform_7(%arg0: i32) -> (i32, i32, i32) {
    %c0_i32 = arith.constant 0 : i32
    %c0_i32_0 = arith.constant 0 : i32
    %c0_i32_1 = arith.constant 0 : i32
    %c0_i32_2 = arith.constant 0 : i32
    return %c0_i32, %c0_i32_0, %c0_i32_1 : i32, i32, i32
  }
  func.func @transform_8(%arg0: i32) -> (i32, i32, i32) {
    %c0_i32 = arith.constant 0 : i32
    %c0_i32_0 = arith.constant 0 : i32
    %c0_i32_1 = arith.constant 0 : i32
    %c0_i32_2 = arith.constant 0 : i32
    return %c0_i32, %c0_i32_0, %c0_i32_1 : i32, i32, i32
  }
  func.func @transform_9(%arg0: i32) -> (i32, i32, i32) {
    %c0_i32 = arith.constant 0 : i32
    %c0_i32_0 = arith.constant 0 : i32
    %c0_i32_1 = arith.constant 0 : i32
    %c0_i32_2 = arith.constant 0 : i32
    return %c0_i32, %c0_i32_0, %c0_i32_1 : i32, i32, i32
  }
  func.func @transform_10(%arg0: i32) -> (i32, i32, i32) {
    %c0_i32 = arith.constant 0 : i32
    %c0_i32_0 = arith.constant 0 : i32
    %c0_i32_1 = arith.constant 0 : i32
    %c0_i32_2 = arith.constant 0 : i32
    return %c0_i32, %c0_i32_0, %c0_i32_1 : i32, i32, i32
  }
  func.func @transform_11(%arg0: i32) -> (i32, i32, i32) {
    %c0_i32 = arith.constant 0 : i32
    %c0_i32_0 = arith.constant 0 : i32
    %c0_i32_1 = arith.constant 0 : i32
    %c0_i32_2 = arith.constant 0 : i32
    return %c0_i32, %c0_i32_0, %c0_i32_1 : i32, i32, i32
  }
  func.func @transform_12(%arg0: i32) -> (i32, i32, i32) {
    %c0_i32 = arith.constant 0 : i32
    %c0_i32_0 = arith.constant 0 : i32
    %c0_i32_1 = arith.constant 0 : i32
    %c0_i32_2 = arith.constant 0 : i32
    return %c0_i32, %c0_i32_0, %c0_i32_1 : i32, i32, i32
  }
  func.func @transform_13(%arg0: i32) -> (i32, i32) {
    %c0_i32 = arith.constant 0 : i32
    %c0_i32_0 = arith.constant 0 : i32
    %c0_i32_1 = arith.constant 0 : i32
    return %c0_i32, %c0_i32_0 : i32, i32
  }
  func.func @transform_14(%arg0: i32) -> (i32, i32) {
    %c0_i32 = arith.constant 0 : i32
    %c0_i32_0 = arith.constant 0 : i32
    %c0_i32_1 = arith.constant 0 : i32
    return %c0_i32, %c0_i32_0 : i32, i32
  }
  func.func @transform_15(%arg0: i32) -> (i32, i32) {
    %c0_i32 = arith.constant 0 : i32
    %c0_i32_0 = arith.constant 0 : i32
    %c0_i32_1 = arith.constant 0 : i32
    return %c0_i32, %c0_i32_0 : i32, i32
  }
  func.func @transform_16(%arg0: i32) -> (i32, i32) {
    %c0_i32 = arith.constant 0 : i32
    %c0_i32_0 = arith.constant 0 : i32
    %c0_i32_1 = arith.constant 0 : i32
    return %c0_i32, %c0_i32_0 : i32, i32
  }
  func.func @transform_17(%arg0: i32) -> (i32, i32) {
    %c0_i32 = arith.constant 0 : i32
    %c0_i32_0 = arith.constant 0 : i32
    %c0_i32_1 = arith.constant 0 : i32
    return %c0_i32, %c0_i32_0 : i32, i32
  }
  func.func @transform_18(%arg0: i32) -> (i32, i32) {
    %c0_i32 = arith.constant 0 : i32
    %c0_i32_0 = arith.constant 0 : i32
    %c0_i32_1 = arith.constant 0 : i32
    return %c0_i32, %c0_i32_0 : i32, i32
  }
  func.func @transform_19(%arg0: i32) -> (i32, i32, i32) {
    %c0_i32 = arith.constant 0 : i32
    %c0_i32_0 = arith.constant 0 : i32
    %c0_i32_1 = arith.constant 0 : i32
    return %arg0, %c0_i32, %c0_i32_0 : i32, i32, i32
  }
}

</mosaic_0001>

<bundles_post_ra>
// kernel: tpu_custom_call.1
= control target key start
LH: loop header
LB: loop body
LE: loop exit
PB: predicated region body
PF: predicated region fallthrough
CT: control target
= control target key end

     0   :  { %s7485_s0 = inlined_call_operand.vmem [shape: f32[2,8,32], index: 0, kind: input, shape index: {}]   ;;  %s7486_s1 = inlined_call_operand.vmem [shape: f32[2,16,32], index: 1, kind: input, shape index: {}]   ;;  %s7487_s2 = inlined_call_operand.vmem [shape: f32[2,8,8], index: 2, kind: input, shape index: {}]   ;;  %s7488_s3 = inlined_call_operand.vmem [shape: f32[2,8,8], index: 3, kind: input, shape index: {}]   ;;  %s7489_s4 = inlined_call_operand.vmem [shape: f32[2,8,8], index: 4, kind: input, shape index: {}]   ;;  %s7490_s5 = inlined_call_operand.vmem [shape: f32[8,8,16], index: 5, kind: input, shape index: {}]   ;;  %s7491_s6 = inlined_call_operand.vmem [shape: f32[4,32,24], index: 6, kind: input, shape index: {}]   ;;  %s7492_s7 = inlined_call_operand.vmem [shape: f32[4,32,8], index: 7, kind: input, shape index: {}]   ;;  %s7493_s8 = inlined_call_operand.vmem [shape: f32[4,1,8], index: 8, kind: input, shape index: {}]   ;;  %s7494_s9 = inlined_call_operand.vmem [shape: f32[4,1,8], index: 9, kind: input, shape index: {}]   ;;  %s7495_s10 = inlined_call_operand.vmem [shape: f32[4,1,8], index: 10, kind: input, shape index: {}]   ;;  %s7496_s11 = inlined_call_operand.vmem [shape: f32[4,2,8], index: 11, kind: input, shape index: {}]   ;;  %s7497_s12 = inlined_call_operand.vmem [shape: f32[4,8,32], index: 12, kind: input, shape index: {}]   ;;  %s7498_s13 = inlined_call_operand.vmem [shape: f32[2,32], index: 13, kind: input, shape index: {}]   ;;  %s7499_s14 = inlined_call_operand.vmem [shape: f32[32,64], index: 14, kind: input, shape index: {}]   ;;  %s7500_s15 = inlined_call_operand.vmem [shape: f32[1,64], index: 15, kind: input, shape index: {}]   ;;  %s7501_s16 = inlined_call_operand.vmem [shape: f32[64,32], index: 16, kind: input, shape index: {}]   ;;  %s7502_s17 = inlined_call_operand.vmem [shape: f32[1,32], index: 17, kind: input, shape index: {}]   ;;  %s7503_s18 = inlined_call_operand.vmem [shape: f32[2,32], index: 18, kind: input, shape index: {}]   ;;  %s7504_s19 = inlined_call_operand.hbm [shape: f32[2,8,32], index: 19, kind: output, shape index: {}]  }
   0x1   :  { %7519 = sst [smem:[#allocation12_spill]] %s7485_s0 }
   0x2   :  { %7520 = sst [smem:[#allocation13_spill]] %s7486_s1 }
   0x3   :  { %7521 = sst [smem:[#allocation14_spill]] %s7487_s2 }
   0x4   :  { %7522 = sst [smem:[#allocation15_spill]] %s7488_s3 }
   0x5   :  { %v72_v0 = vld [vmem:[%s7491_s6 + $0x18] sm:$0xff]  ;;  %v71_v2 = vld [vmem:[%s7491_s6 + $0x10] sm:$0xff]  ;;  %v70_v4 = vld [vmem:[%s7491_s6 + $0x8] sm:$0xff]  ;;  %s7523_s21 = sld [smem:[#allocation12_spill]]  ;;  %vm85_vm0 = vcmask 261120  }
   0x6   :  { %v76_v1 = vld [vmem:[%s7491_s6 + $0x38] sm:$0xff]  ;;  %5583 = vmatprep.subr.mxu0 %v72_v0  ;;  %v75_v3 = vld [vmem:[%s7491_s6 + $0x30] sm:$0xff]  ;;  %v74_v5 = vld [vmem:[%s7491_s6 + $0x28] sm:$0xff] }
   0x7   :  { %5594 = vmatprep.subr.mxu1 %v76_v1  ;;  %5584 = vmatpush3.msra.mxu0 %v72_v0  ;;  %v69_v6 = vld [vmem:[%s7491_s6] sm:$0xff]  ;;  %v80_v10 = vld [vmem:[%s7491_s6 + $0x58] sm:$0xff]  ;;  %v79_v12 = vld [vmem:[%s7491_s6 + $0x50] sm:$0xff] }
   0x8   :  { %5595 = vmatpush3.msra.mxu1 %v76_v1  ;;  %5585 = vmatprep.subr.mxu0 %v71_v2  ;;  %v73_v7 = vld [vmem:[%s7491_s6 + $0x20] sm:$0xff]  ;;  %v84_v11 = vld [vmem:[%s7491_s6 + $0x78] sm:$0xff]  ;;  %v83_v13 = vld [vmem:[%s7491_s6 + $0x70] sm:$0xff] }
   0x9   :  { %5596 = vmatprep.subr.mxu1 %v75_v3  ;;  %5586 = vmatpush3.msra.mxu0 %v71_v2  ;;  %v78_v14 = vld [vmem:[%s7491_s6 + $0x48] sm:$0xff] }
   0xa   :  { %5597 = vmatpush3.msra.mxu1 %v75_v3  ;;  %5587 = vmatprep.subr.mxu0 %v70_v4 }
   0xb   :  { %5598 = vmatprep.subr.mxu1 %v74_v5  ;;  %v63_v8 = vld [vmem:[%s7523_s21] sm:$0xff]  ;;  %5588 = vmatpush3.msra.mxu0 %v70_v4  ;;  %v64_v9 = vld [vmem:[%s7523_s21 + $0x8] sm:$0xff] }
   0xc   :  { %5599 = vmatpush3.msra.mxu1 %v74_v5  ;;  %5589 = vmatprep.subr.mxu0 %v69_v6 }
   0xd   :  { %5600 = vmatprep.subr.mxu1 %v73_v7  ;;  %5590 = vmatpush3.msra.mxu0 %v69_v6 }
   0xe   :  { %5591 = vmatprep.mubr.msk.f32.mxu0 %vm85_vm0, %v63_v8  ;;  %5601 = vmatpush3.msra.mxu1 %v73_v7 }
   0xf   :  { %5602 = vmatprep.mubr.msk.f32.mxu1 %vm85_vm0, %v63_v8  ;;  %5592 = vmatmul.mubr.msk.f32.vlgmr.msra.gmra.mxu0 %vm85_vm0, %v64_v9 }
  0x10   :  { %5603 = vmatmul.mubr.msk.f32.vlgmr.msra.gmra.mxu1 %vm85_vm0, %v64_v9  ;;  %5605 = vmatprep.subr.mxu0 %v80_v10 }
  0x11   :  { %5616 = vmatprep.subr.mxu1 %v84_v11  ;;  %5606 = vmatpush3.msra.mxu0 %v80_v10 }
  0x12   :  { %5617 = vmatpush3.msra.mxu1 %v84_v11 }
  0x13   :  { %24 = vsyncpa [#allocation3], 0  ;;  %5607 = vmatprep.subr.mxu0 %v79_v12  ;;  %5618 = vmatprep.subr.mxu1 %v83_v13  ;;  %v82_v15 = vld [vmem:[%s7491_s6 + $0x68] sm:$0xff]  ;;  %v77_v16 = vld [vmem:[%s7491_s6 + $0x40] sm:$0xff]  ;;  %s7524_s0 = sld [smem:[#allocation13_spill]]  ;;  %vm872_vm1 = vcmask 64512  }
  0x14   :  { %5608 = vmatpush3.msra.mxu0 %v79_v12  ;;  %5613 = vmatprep.mubr.msk.f32.mxu0 %vm85_vm0, %v63_v8  ;;  %v81_v17 = vld [vmem:[%s7491_s6 + $0x60] sm:$0xff]  ;;  %v395_v18 = vld [vmem:[%s7492_s7 + $0x18] sm:$0xff]  ;;  %v394_v19 = vld [vmem:[%s7492_s7 + $0x10] sm:$0xff]  ;;  %s5989_s27 = smov 120   ;;  %v7509_v54 = vmov 0.0   ;;  %v5991_v58 = vmov 0  }
  0x15   :  { %5609 = vmatprep.subr.mxu0 %v78_v14  ;;  %5619 = vmatpush3.msra.mxu1 %v83_v13  ;;  %v393_v20 = vld [vmem:[%s7492_s7 + $0x8] sm:$0xff]  ;;  %v399_v22 = vld [vmem:[%s7492_s7 + $0x38] sm:$0xff]  ;;  %v392_v23 = vld [vmem:[%s7492_s7] sm:$0xff]  ;;  %vm5992_vm2 = vmmov 0   ;;  %vm2639_vm3 = vcmask 130048   ;;  %vm2973_vm4 = vcmask 1041409  }
  0x16   :  { %5610 = vmatpush3.msra.mxu0 %v78_v14  ;;  %5620 = vmatprep.subr.mxu1 %v82_v15  ;;  %v398_v24 = vld [vmem:[%s7492_s7 + $0x30] sm:$0xff]  ;;  %v397_v27 = vld [vmem:[%s7492_s7 + $0x28] sm:$0xff]  ;;  %v396_v28 = vld [vmem:[%s7492_s7 + $0x20] sm:$0xff]  ;;  %vm2975_vm5 = vcmask 1042434   ;;  %vm2977_vm6 = vcmask 1043459   ;;  %vm2979_vm7 = vcmask 1044484  }
  0x17   :  { %5611 = vmatprep.subr.mxu0 %v77_v16  ;;  %5621 = vmatpush3.msra.mxu1 %v82_v15  ;;  %v403_v29 = vld [vmem:[%s7492_s7 + $0x58] sm:$0xff]  ;;  %v402_v31 = vld [vmem:[%s7492_s7 + $0x50] sm:$0xff]  ;;  %v401_v32 = vld [vmem:[%s7492_s7 + $0x48] sm:$0xff]  ;;  %vm2983_vm8 = vcmask 1046534   ;;  %vm2981_vm9 = vcmask 1045509   ;;  %vm2985_vm10 = vcmask 1047559  }
  0x18   :  { %5612 = vmatpush3.msra.mxu0 %v77_v16  ;;  %5622 = vmatprep.subr.mxu1 %v81_v17  ;;  %v400_v33 = vld [vmem:[%s7492_s7 + $0x40] sm:$0xff]  ;;  %v407_v34 = vld [vmem:[%s7492_s7 + $0x78] sm:$0xff]  ;;  %v406_v35 = vld [vmem:[%s7492_s7 + $0x70] sm:$0xff]  ;;  %s7535_s29 = sld [smem:[#allocation15_spill]]  ;;  %s5995_s23 = smov 112   ;;  %vm5175_vm11 = vcmask 523264  }
  0x19   :  { %5614 = vmatmul.mubr.msk.f32.vlgmr.msra.gmra.mxu0 %vm85_vm0, %v64_v9  ;;  %5627 = vmatprep.subr.mxu0 %v395_v18  ;;  %v6171_v21 = vld [vmem:[%s7524_s0] sm:$0xff]  ;;  %v66_v25 = vld [vmem:[%s7524_s0 + $0x8] sm:$0xff]  ;;  %v67_v26 = vld [vmem:[%s7524_s0 + $0x10] sm:$0xff]  ;;  %s7536_s20 = sld [smem:[#allocation14_spill]] }
  0x1a   :  { %5628 = vmatpush3.msra.mxu0 %v395_v18  ;;  %5623 = vmatpush3.msra.mxu1 %v81_v17  ;;  %v68_v30 = vld [vmem:[%s7524_s0 + $0x18] sm:$0xff]  ;;  %v405_v36 = vld [vmem:[%s7492_s7 + $0x68] sm:$0xff]  ;;  %v404_v37 = vld [vmem:[%s7492_s7 + $0x60] sm:$0xff]  ;;  %s5996_s7 = smov [#allocation2]  }
  0x1b   :  { %5629 = vmatprep.subr.mxu0 %v394_v19  ;;  %5624 = vmatprep.mubr.msk.f32.mxu1 %vm85_vm0, %v63_v8  ;;  %v868_v38 = vld [vmem:[%s7496_s11] sm:$0x3]  ;;  %v869_v39 = vld [vmem:[%s7496_s11 + $0x2] sm:$0x3]  ;;  %v870_v40 = vld [vmem:[%s7496_s11 + $0x4] sm:$0x3] }
  0x1c   :  { %5630 = vmatpush3.msra.mxu0 %v394_v19  ;;  %5625 = vmatmul.mubr.msk.f32.vlgmr.msra.gmra.mxu1 %vm85_vm0, %v64_v9  ;;  %v871_v41 = vld [vmem:[%s7496_s11 + $0x6] sm:$0x3]  ;;  %v5350_v44 = vld [vmem:[%s7495_s10 + $0x1] ss:$0 sm:$0xff]  ;;  %v5349_v47 = vld [vmem:[%s7495_s10] ss:$0 sm:$0xff] }
  0x1d   :  { %5631 = vmatprep.subr.mxu0 %v393_v20  ;;  %5635 = vmatprep.mubr.msk.f32.mxu0 %vm85_vm0, %v6171_v21  ;;  %v5351_v52 = vld [vmem:[%s7495_s10 + $0x2] ss:$0 sm:$0xff]  ;;  %v5352_v57 = vld [vmem:[%s7495_s10 + $0x3] ss:$0 sm:$0xff]  ;;  %v5345_v3 = vld [vmem:[%s7494_s9] ss:$0 sm:$0xff] }
  0x1e   :  { %5632 = vmatpush3.msra.mxu0 %v393_v20  ;;  %5641 = vmatprep.subr.mxu1 %v399_v22  ;;  %v5346_v10 = vld [vmem:[%s7494_s9 + $0x1] ss:$0 sm:$0xff]  ;;  %v5347_v18 = vld [vmem:[%s7494_s9 + $0x2] ss:$0 sm:$0xff]  ;;  %s5306_s22 = sshll.u32 %s5996_s7, 4  ;;  %s5307_s22 = int_to_ptr.vmem [resolvable:$true] %s5306_s22 }
  0x1f   :  { %5633 = vmatprep.subr.mxu0 %v392_v23  ;;  %5642 = vmatpush3.msra.mxu1 %v399_v22  ;;  %p5972_p1 = scmp.lt.s32.totalorder %s5307_s22, %s5307_s22 }
  0x20   :  { %5634 = vmatpush3.msra.mxu0 %v392_v23  ;;  %5643 = vmatprep.subr.mxu1 %v398_v24 }
  0x21   :  { %5636 = vmatmul.mubr.msk.f32.vlgmr.msra.gmra.mxu0 %vm85_vm0, %v66_v25  ;;  %5644 = vmatpush3.msra.mxu1 %v398_v24  ;;  %v5348_v24 = vld [vmem:[%s7494_s9 + $0x3] ss:$0 sm:$0xff] }
  0x22   :  { %5638 = vmatprep.mubr.msk.f32.mxu0 %vm85_vm0, %v67_v26  ;;  %5645 = vmatprep.subr.mxu1 %v397_v27 }
  0x23   :  { %5646 = vmatpush3.msra.mxu1 %v397_v27  ;;  %5649 = vmatprep.mubr.msk.f32.mxu1 %vm85_vm0, %v6171_v21 }
  0x24   :  { %5647 = vmatprep.subr.mxu1 %v396_v28  ;;  %5655 = vmatprep.subr.mxu0 %v403_v29 }
  0x25   :  { %5639 = vmatmul.mubr.msk.f32.gmra.mxu0 %vm85_vm0, %v68_v30  ;;  %5648 = vmatpush3.msra.mxu1 %v396_v28  ;;  %v5341_v28 = vld [vmem:[%s7493_s8] ss:$0 sm:$0xff] }
  0x26   :  { %5650 = vmatmul.mubr.msk.f32.vlgmr.msra.gmra.mxu1 %vm85_vm0, %v66_v25  ;;  %5656 = vmatpush3.msra.mxu0 %v403_v29 }
  0x27   :  { %5657 = vmatprep.subr.mxu0 %v402_v31  ;;  %5652 = vmatprep.mubr.msk.f32.mxu1 %vm85_vm0, %v67_v26 }
  0x28   :  { %5658 = vmatpush3.msra.mxu0 %v402_v31  ;;  %5663 = vmatprep.mubr.msk.f32.mxu0 %vm85_vm0, %v6171_v21 }
  0x29   :  { %5659 = vmatprep.subr.mxu0 %v401_v32  ;;  %5889 = vmatprep.subr.mxu1 %v407_v34 }
  0x2a   :  { %5653 = vmatmul.mubr.msk.f32.gmra.mxu1 %vm85_vm0, %v68_v30  ;;  %5660 = vmatpush3.msra.mxu0 %v401_v32  ;;  %v5342_v32 = vld [vmem:[%s7493_s8 + $0x1] ss:$0 sm:$0xff] }
  0x2b   :  { %5661 = vmatprep.subr.mxu0 %v400_v33  ;;  %5893 = vmatpush3.msra.mxu1 %v407_v34 }
  0x2c   :  { %5662 = vmatpush3.msra.mxu0 %v400_v33  ;;  %5890 = vmatprep.subr.mxu1 %v406_v35 }
  0x2d   :  { %5664 = vmatmul.mubr.msk.f32.vlgmr.msra.gmra.mxu0 %vm85_vm0, %v66_v25  ;;  %5669 = vmatprep.subr.mxu0 %v407_v34 }
  0x2e   :  { %5670 = vmatpush3.msra.mxu0 %v407_v34  ;;  %5666 = vmatprep.mubr.msk.f32.mxu0 %vm85_vm0, %v67_v26  ;;  %v1859_v34 = vlaneseq }
  0x2f   :  { %5671 = vmatprep.subr.mxu0 %v406_v35  ;;  %5894 = vmatpush3.msra.mxu1 %v406_v35 }
  0x30   :  { %5672 = vmatpush3.msra.mxu0 %v406_v35  ;;  %5891 = vmatprep.subr.mxu1 %v405_v36 }
  0x31   :  { %5667 = vmatmul.mubr.msk.f32.gmra.mxu0 %vm85_vm0, %v68_v30  ;;  %5673 = vmatprep.subr.mxu0 %v405_v36 }
  0x32   :  { %5674 = vmatpush3.msra.mxu0 %v405_v36  ;;  %5677 = vmatprep.mubr.msk.f32.mxu0 %vm85_vm0, %v6171_v21 }
  0x33   :  { %5675 = vmatprep.subr.mxu0 %v404_v37  ;;  %5895 = vmatpush3.msra.mxu1 %v405_v36 }
  0x34   :  { %5676 = vmatpush3.msra.mxu0 %v404_v37  ;;  %5892 = vmatprep.subr.mxu1 %v404_v37 }
  0x35   :  { %5678 = vmatmul.mubr.msk.f32.vlgmr.msra.gmra.mxu0 %vm85_vm0, %v66_v25  ;;  %5896 = vmatpush3.msra.mxu1 %v404_v37 }
  0x36   :  { %5680 = vmatprep.mubr.msk.f32.mxu1 %vm85_vm0, %v67_v26  ;;  %5683 = vmatprep.subr.msk.mxu0 %vm872_vm1, %v868_v38 }
  0x37   :  { %5681 = vmatmul.mubr.msk.f32.vlgmr.msra.gmra.mxu1 %vm85_vm0, %v68_v30  ;;  %5688 = vmatprep.subr.msk.mxu1 %vm872_vm1, %v869_v39 }
  0x38   :  { %5684 = vmatpush3.xpose.msk.msra.mxu0 %vm872_vm1, %v868_v38  ;;  %5689 = vmatpush3.xpose.msk.msra.mxu1 %vm872_vm1, %v869_v39  ;;  %v5343_v38 = vld [vmem:[%s7493_s8 + $0x2] ss:$0 sm:$0xff]  ;;  %v6428_v39 = vshrl.u32 %v1859_v34, 7 }
  0x39   :  { %5693 = vmatprep.subr.msk.mxu0 %vm872_vm1, %v870_v40  ;;  %5698 = vmatprep.subr.msk.mxu1 %vm872_vm1, %v871_v41 }
  0x3a   :  { %5909 = vset.pattern.permute.xlu0 %v5991_v58  ;;  %5907 = vset.pattern.permute.xlu1 %v5991_v58 }
  0xcf   :  { %v6261_v42 = vpop.f32.mrf.mxu0 }
  0xd0   :  { %7525 = vst [vmem:[#allocation5_spill] sm:$0xff] %v6261_v42  ;;  %v6263_v43 = vpop.f32.mrf.mxu1  ;;  %3064 = vrot.lane.b32.xlu0 %v6261_v42, %s5989_s27  ;;  %v861_v51 = vadd.f32 %v6261_v42, %v5349_v47  ;;  %v825_v8 = vadd.f32 %v6261_v42, %v5345_v3  ;;  %v789_v31 = vadd.f32 %v6261_v42, %v5341_v28 }
  0xd1   :  { %7526 = vst [vmem:[#allocation6_spill] sm:$0xff] %v6263_v43  ;;  %3316 = vrot.lane.b32.xlu1 %v6263_v43, %s5989_s27  ;;  %v6272_v45 = vpop.f32.mrf.mxu0  ;;  %v863_v48 = vadd.f32 %v6263_v43, %v5350_v44  ;;  %v827_v16 = vadd.f32 %v6263_v43, %v5346_v10  ;;  %v791_v36 = vadd.f32 %v6263_v43, %v5342_v32 }
  0xd2   :  { %v6274_v46 = vpop.f32.mrf.mxu1  ;;  %v860_v50 = vadd.f32 %v5349_v47, %v6272_v45  ;;  %v824_v5 = vadd.f32 %v5345_v3, %v6272_v45  ;;  %v788_v37 = vadd.f32 %v5341_v28, %v6272_v45 }
  0xd3   :  { %7527 = vst [vmem:[#allocation7_spill] sm:$0xff] %v6274_v46  ;;  %v862_v49 = vadd.f32 %v5350_v44, %v6274_v46  ;;  %v826_v12 = vadd.f32 %v5346_v10, %v6274_v46  ;;  %v790_v47 = vadd.f32 %v5342_v32, %v6274_v46 }
  0xd4   :  { %2929 = vrot.lane.b32.xlu0 %v6272_v45, %s5989_s27  ;;  %5685 = vmatprep.mubr.msk.f32.mxu0 %vm872_vm1, %v860_v50  ;;  %v5344_v50 = vld [vmem:[%s7493_s8 + $0x3] ss:$0 sm:$0xff] }
  0xd5   :  { %3190 = vrot.lane.b32.xlu1 %v6274_v46, %s5989_s27  ;;  %5690 = vmatprep.mubr.msk.f32.mxu1 %vm872_vm1, %v862_v49 }
  0xd6   :  { %5691 = vmatmul.mubr.msk.f32.vlgmr.msra.gmra.mxu1 %vm872_vm1, %v863_v48  ;;  %5686 = vmatmul.mubr.msk.f32.vlgmr.msra.gmra.mxu0 %vm872_vm1, %v861_v51 }
  0xd7   :  { %5699 = vmatpush3.xpose.msk.msra.mxu1 %vm872_vm1, %v871_v41  ;;  %5694 = vmatpush3.xpose.msk.msra.mxu0 %vm872_vm1, %v870_v40  ;;  %v2940_v40 = vand.u32 127, %v1859_v34  ;;  %v6509_v34 = vsub.s32 0, %v6428_v39 }
  0xd8   :  { %5710 = vmatprep.subr.mxu1 %v7509_v54  ;;  %5703 = vmatprep.subr.mxu0 %v7509_v54 }
  0xd9   :  { %v6295_v53 = vpop.f32.mrf.mxu0  ;;  %v6435_v44 = vsub.s32 %v2940_v40, %v6428_v39 }
  0xda   :  { %7528 = vst [vmem:[#allocation8_spill] sm:$0xff] %v6295_v53  ;;  %3568 = vrot.lane.b32.xlu1 %v6295_v53, %s5989_s27  ;;  %v865_v55 = vadd.f32 %v6295_v53, %v5351_v52  ;;  %v829_v21 = vadd.f32 %v6295_v53, %v5347_v18  ;;  %v793_v48 = vadd.f32 %v6295_v53, %v5343_v38 }
  0xdb   :  { %v6303_v56 = vpop.f32.mrf.mxu0 }
  0xdc   :  { %7529 = vst [vmem:[#allocation9_spill] sm:$0xff] %v6303_v56  ;;  %v6310_v59 = vpop.f32.mrf.mxu1  ;;  %3442 = vrot.lane.b32.xlu0 %v6303_v56, %s5989_s27  ;;  %v864_v60 = vadd.f32 %v5351_v52, %v6303_v56  ;;  %v828_v19 = vadd.f32 %v5347_v18, %v6303_v56  ;;  %v792_v52 = vadd.f32 %v5343_v38, %v6303_v56 }
  0xdd   :  { %7530 = vst [vmem:[#allocation10_spill] sm:$0xff] %v6310_v59  ;;  %v867_v61 = vadd.f32 %v6310_v59, %v5352_v57  ;;  %v831_v27 = vadd.f32 %v6310_v59, %v5348_v24 }
  0xde   :  { %3820 = vrot.lane.b32.xlu1 %v6310_v59, %s5989_s27  ;;  %v6318_v62 = vpop.f32.mrf.mxu1  ;;  %5695 = vmatprep.mubr.msk.f32.mxu0 %vm872_vm1, %v864_v60 }
  0xdf   :  { %7531 = vst [vmem:[#allocation11_spill] sm:$0xff] %v6318_v62  ;;  %5696 = vmatmul.mubr.msk.f32.vlgmr.msra.gmra.mxu0 %vm872_vm1, %v865_v55  ;;  %v866_v63 = vadd.f32 %v5352_v57, %v6318_v62  ;;  %v830_v25 = vadd.f32 %v5348_v24, %v6318_v62  ;;  %v795_v55 = vadd.f32 %v6310_v59, %v5344_v50 }
  0xe0   :  { %3694 = vrot.lane.b32.xlu0 %v6318_v62, %s5989_s27  ;;  %5707 = vmatprep.mubr.msk.f32.mxu0 %vm5992_vm2, %v7509_v54  ;;  %v794_v60 = vadd.f32 %v5344_v50, %v6318_v62  ;;  %v6525_v50 = vld [vmem:[%s7490_s5 + $0x8] sm:$0xff] }
  0xe1   :  { %v5637_v0 = vpop.f32.mrf.mxu0  ;;  %5700 = vmatprep.mubr.msk.f32.mxu1 %vm872_vm1, %v866_v63 }
  0xe2   :  { %5704 = vmatpush3.xpose.msk.msra.mxu0 %vm872_vm1, %v5637_v0  ;;  %5701 = vmatmul.mubr.msk.f32.vlgmr.msra.gmra.mxu1 %vm872_vm1, %v867_v61  ;;  %v7511_v0 = vmov 1  }
  0xe3   :  { %v486_v1 = vpop.f32.mrf.mxu0  ;;  %5705 = vmatprep.subr.mxu0 %v7509_v54  ;;  %5714 = vmatprep.mubr.msk.f32.mxu1 %vm5992_vm2, %v7509_v54 }
  0xe5   :  { %v5640_v2 = vpop.f32.mrf.mxu0 }
  0xe6   :  { %5706 = vmatpush3.xpose.msk.msra.mxu0 %vm872_vm1, %v486_v1  ;;  %5711 = vmatpush3.xpose.msk.msra.mxu1 %vm872_vm1, %v5640_v2  ;;  %v5651_v4 = vpop.f32.mrf.mxu1 }
  0xe7   :  { %v496_v6 = vpop.f32.mrf.mxu0  ;;  %5712 = vmatprep.subr.mxu1 %v7509_v54  ;;  %5717 = vmatprep.subr.mxu0 %v7509_v54 }
  0xe8   :  { %v571_v7 = vpop.f32.mrf.mxu1 }
  0xe9   :  { %5708 = vmatmul.mubr.msk.f32.vlgmr.msra.gmra.mxu0 %vm872_vm1, %v824_v5 }
  0xea   :  { %5713 = vmatpush3.xpose.msk.msra.mxu1 %vm872_vm1, %v496_v6  ;;  %5718 = vmatpush3.xpose.msk.msra.mxu0 %vm872_vm1, %v5651_v4  ;;  %v5654_v9 = vpop.f32.mrf.mxu1 }
  0xeb   :  { %5719 = vmatprep.subr.mxu0 %v7509_v54  ;;  %5724 = vmatprep.subr.mxu1 %v7509_v54 }
  0xec   :  { %5721 = vmatprep.mubr.msk.f32.mxu0 %vm5992_vm2, %v7509_v54  ;;  %v581_v13 = vpop.f32.mrf.mxu1 }
  0xed   :  { %5715 = vmatmul.mubr.msk.f32.vlgmr.msra.gmra.mxu1 %vm872_vm1, %v825_v8  ;;  %v5665_v11 = vpop.f32.mrf.mxu0 }
  0xee   :  { %5720 = vmatpush3.xpose.msk.msra.mxu0 %vm872_vm1, %v571_v7  ;;  %5725 = vmatpush3.xpose.msk.msra.mxu1 %vm872_vm1, %v5654_v9 }
  0xef   :  { %5726 = vmatprep.subr.mxu1 %v7509_v54  ;;  %5731 = vmatprep.subr.mxu0 %v7509_v54  ;;  %v656_v14 = vpop.f32.mrf.mxu0 }
  0xf0   :  { %5728 = vmatprep.mubr.msk.f32.mxu1 %vm5992_vm2, %v7509_v54 }
  0xf1   :  { %5722 = vmatmul.mubr.msk.f32.vlgmr.msra.gmra.mxu0 %vm872_vm1, %v826_v12  ;;  %v5668_v15 = vpop.f32.mrf.mxu0 }
  0xf2   :  { %5727 = vmatpush3.xpose.msk.msra.mxu1 %vm872_vm1, %v581_v13  ;;  %5732 = vmatpush3.xpose.msk.msra.mxu0 %vm872_vm1, %v5665_v11  ;;  %v5994_v11 = vmov 1966171168  }
  0xf3   :  { %5733 = vmatprep.subr.mxu0 %v7509_v54  ;;  %5738 = vmatprep.subr.mxu1 %v7509_v54  ;;  %v666_v17 = vpop.f32.mrf.mxu0  ;;  %v1857_v12 = vunpack.c.l.s4 %v5994_v11 }
  0xf4   :  { %5735 = vmatprep.mubr.msk.f32.mxu0 %vm5992_vm2, %v7509_v54 }
  0xf5   :  { %5729 = vmatmul.mubr.msk.f32.vlgmr.msra.gmra.mxu1 %vm872_vm1, %v827_v16  ;;  %v5679_v20 = vpop.f32.mrf.mxu0 }
  0xf6   :  { %5734 = vmatpush3.xpose.msk.msra.mxu0 %vm872_vm1, %v656_v14  ;;  %5739 = vmatpush3.xpose.msk.msra.mxu1 %vm872_vm1, %v5668_v15  ;;  %v1858_v15 = vunpack.c.0.s8 %v1857_v12 }
  0xf7   :  { %5740 = vmatprep.subr.mxu1 %v7509_v54  ;;  %5745 = vmatprep.subr.mxu0 %v7509_v54  ;;  %v741_v22 = vpop.f32.mrf.mxu0  ;;  %v5682_v23 = vpop.f32.mrf.mxu1 }
  0xf8   :  { %5742 = vmatprep.mubr.msk.f32.mxu1 %vm5992_vm2, %v7509_v54  ;;  %v6488_v18 = vsub.s32 %v1858_v15, %v6428_v39 }
  0xf9   :  { %5736 = vmatmul.mubr.msk.f32.vlgmr.msra.gmra.mxu0 %vm872_vm1, %v828_v19  ;;  %v751_v26 = vpop.f32.mrf.mxu1 }
  0xfa   :  { %5741 = vmatpush3.xpose.msk.msra.mxu1 %vm872_vm1, %v666_v17  ;;  %5746 = vmatpush3.xpose.msk.msra.mxu0 %vm872_vm1, %v5679_v20 }
  0xfb   :  { %5747 = vmatprep.subr.mxu0 %v7509_v54  ;;  %5752 = vmatprep.subr.mxu1 %v7509_v54 }
  0xfc   :  { %5749 = vmatprep.mubr.msk.f32.mxu0 %vm5992_vm2, %v7509_v54 }
  0xfd   :  { %5743 = vmatmul.mubr.msk.f32.vlgmr.msra.gmra.mxu1 %vm872_vm1, %v829_v21 }
  0xfe   :  { %5748 = vmatpush3.xpose.msk.msra.mxu0 %vm872_vm1, %v741_v22  ;;  %5753 = vmatpush3.xpose.msk.msra.mxu1 %vm872_vm1, %v5682_v23 }
  0xff   :  { %5754 = vmatprep.subr.mxu1 %v7509_v54  ;;  %5756 = vmatprep.mubr.msk.f32.mxu1 %vm5992_vm2, %v7509_v54 }
 0x100   :  { %5759 = vmatprep.subr.mxu0 %v7509_v54 }
 0x101   :  { %5750 = vmatmul.mubr.msk.f32.vlgmr.msra.gmra.mxu0 %vm872_vm1, %v830_v25 }
 0x102   :  { %5755 = vmatpush3.xpose.msk.msra.mxu1 %vm872_vm1, %v751_v26  ;;  %5761 = vmatprep.mubr.msk.f32.mxu0 %vm5992_vm2, %v7509_v54 }
 0x103   :  { %5764 = vmatprep.subr.mxu1 %v7509_v54 }
 0x105   :  { %5757 = vmatmul.mubr.msk.f32.vlgmr.msra.gmra.mxu1 %vm872_vm1, %v831_v27 }
 0x106   :  { %5766 = vmatprep.mubr.msk.f32.mxu1 %vm5992_vm2, %v7509_v54 }
 0x142   :  { %v3065_v30 = vpop.permute.xlu0 %3064 }
 0x143   :  { %v3317_v29 = vpop.permute.xlu1 %3316  ;;  %5765 = vmatpush3.xpose.msk.msra.mxu1 %vm872_vm1, %v3065_v30 }
 0x144   :  { %5774 = vmatprep.subr.mxu1 %v7509_v54 }
 0x146   :  { %v2930_v35 = vpop.permute.xlu0 %2929  ;;  %5767 = vmatmul.mubr.msk.f32.vlgmr.msra.gmra.mxu1 %vm872_vm1, %v789_v31 }
 0x147   :  { %v3191_v33 = vpop.permute.xlu1 %3190  ;;  %5760 = vmatpush3.xpose.msk.msra.mxu0 %vm872_vm1, %v2930_v35  ;;  %5775 = vmatpush3.xpose.msk.msra.mxu1 %vm872_vm1, %v3317_v29 }
 0x148   :  { %5776 = vmatprep.mubr.msk.f32.mxu1 %vm5992_vm2, %v7509_v54  ;;  %5769 = vmatprep.subr.mxu0 %v7509_v54 }
 0x149   :  { %5784 = vmatprep.subr.mxu1 %v7509_v54 }
 0x14a   :  { %5762 = vmatmul.mubr.msk.f32.vlgmr.msra.gmra.mxu0 %vm872_vm1, %v788_v37  ;;  %5777 = vmatmul.mubr.msk.f32.vlgmr.msra.gmra.mxu1 %vm872_vm1, %v791_v36 }
 0x14b   :  { %5770 = vmatpush3.xpose.msk.msra.mxu0 %vm872_vm1, %v3191_v33  ;;  %5771 = vmatprep.mubr.msk.f32.mxu0 %vm5992_vm2, %v7509_v54 }
 0x14c   :  { %v3569_v41 = vpop.permute.xlu1 %3568  ;;  %5786 = vmatprep.mubr.msk.f32.mxu1 %vm5992_vm2, %v7509_v54  ;;  %5779 = vmatprep.subr.mxu0 %v7509_v54 }
 0x14d   :  { %5785 = vmatpush3.xpose.msk.msra.mxu1 %vm872_vm1, %v3569_v41 }
 0x14e   :  { %v3443_v49 = vpop.permute.xlu0 %3442  ;;  %5794 = vmatprep.subr.mxu1 %v7509_v54  ;;  %5772 = vmatmul.mubr.msk.f32.vlgmr.msra.gmra.mxu0 %vm872_vm1, %v790_v47 }
 0x14f   :  { %5780 = vmatpush3.xpose.msk.msra.mxu0 %vm872_vm1, %v3443_v49  ;;  %5781 = vmatprep.mubr.msk.f32.mxu0 %vm5992_vm2, %v7509_v54 }
 0x150   :  { %v3821_v51 = vpop.permute.xlu1 %3820  ;;  %5787 = vmatmul.mubr.msk.f32.vlgmr.msra.gmra.mxu1 %vm872_vm1, %v793_v48  ;;  %5789 = vmatprep.subr.mxu0 %v7509_v54 }
 0x151   :  { %5795 = vmatpush3.xpose.msk.msra.mxu1 %vm872_vm1, %v3821_v51  ;;  %5796 = vmatprep.mubr.msk.f32.mxu1 %vm5992_vm2, %v7509_v54 }
 0x152   :  { %v3695_v57 = vpop.permute.xlu0 %3694  ;;  %5804 = vmatprep.subr.mxu1 %v7509_v54  ;;  %5782 = vmatmul.mubr.msk.f32.vlgmr.msra.gmra.mxu0 %vm872_vm1, %v792_v52 }
 0x153   :  { %5790 = vmatpush3.xpose.msk.msra.mxu0 %vm872_vm1, %v3695_v57  ;;  %5791 = vmatprep.mubr.msk.f32.mxu0 %vm5992_vm2, %v7509_v54 }
 0x154   :  { %5797 = vmatmul.mubr.msk.f32.vlgmr.msra.gmra.mxu1 %vm872_vm1, %v795_v55  ;;  %5799 = vmatprep.subr.mxu0 %v7509_v54  ;;  %v6534_v55 = vld [vmem:[%s7490_s5] sm:$0xff] }
 0x155   :  { %5806 = vmatprep.mubr.msk.f32.mxu1 %vm5992_vm2, %v7509_v54 }
 0x156   :  { %5792 = vmatmul.mubr.msk.f32.vlgmr.msra.gmra.mxu0 %vm872_vm1, %v794_v60 }
 0x157   :  { %5801 = vmatprep.mubr.msk.f32.mxu0 %vm5992_vm2, %v7509_v54 }
 0x196   :  { %v5692_v61 = vpop.f32.mrf.mxu1  ;;  %v5687_v63 = vpop.f32.mrf.mxu0 }
 0x197   :  { %2849 = vperm.xlu0 %5909, %v5692_v61   ;;  %2839 = vperm.xlu1 %5907, %v5687_v63  }
 0x198   :  { %v948_v1 = vpop.f32.mrf.mxu0  ;;  %v1032_v3 = vpop.f32.mrf.mxu1 }
 0x19b   :  { %5910 = vset.pattern.permute.xlu0 %v7511_v0  ;;  %5908 = vset.pattern.permute.xlu1 %v7511_v0 }
 0x19c   :  { %2893 = vperm.xlu0 %5910, %v5692_v61   ;;  %2885 = vperm.xlu1 %5908, %v5687_v63   ;;  %v6543_v63 = vld [vmem:[%s7490_s5 + $0x10] sm:$0xff] }
 0x19f   :  { %v5697_v2 = vpop.f32.mrf.mxu0 }
 0x1a0   :  { %2881 = vperm.xlu0 %5910, %v948_v1   ;;  %5911 = vset.pattern.permute.xlu1 %v5991_v58 }
 0x1a1   :  { %2834 = vperm.xlu1 %5911, %v948_v1   ;;  %v1116_v4 = vpop.f32.mrf.mxu0 }
 0x1a2   :  { %v6476_v5 = vpop.f32.mrf.mxu1 }
 0x1a4   :  { %5912 = vset.pattern.permute.xlu0 %v5991_v58  ;;  %v6479_v7 = vpop.f32.mrf.mxu1 }
 0x1a5   :  { %2844 = vperm.xlu0 %5912, %v1032_v3   ;;  %5913 = vset.pattern.permute.xlu1 %v7511_v0 }
 0x1a6   :  { %2889 = vperm.xlu1 %5913, %v1032_v3  }
 0x1a9   :  { %v1290_v6 = vpop.f32.mrf.mxu0  ;;  %5915 = vset.pattern.permute.xlu0 %v7511_v0 }
 0x1aa   :  { %2901 = vperm.xlu0 %5915, %v5697_v2   ;;  %5914 = vset.pattern.permute.xlu1 %v5991_v58  ;;  %v1862_v21 = vrot.slane %v1290_v6, %v6488_v18  ;;  %v1855_v23 = vcombine.high %v1290_v6, %v1290_v6 }
 0x1ab   :  { %v5709_v8 = vpop.f32.mrf.mxu0  ;;  %2859 = vperm.xlu1 %5914, %v5697_v2  }
 0x1ac   :  { %v1870_v25 = vcombine.high %v1862_v21, %v1862_v21  ;;  %v1878_v28 = vrot.slane %v1862_v21, %v6488_v18 }
 0x1ad   :  { %v1369_v9 = vpop.f32.mrf.mxu1 }
 0x1ae   :  { %5916 = vset.pattern.permute.xlu0 %v5991_v58  ;;  %v1911_v26 = vrot.slane %v1369_v9, %v6488_v18  ;;  %v6504_v30 = vrot.slane %v1870_v25, %v6488_v18  ;;  %v1904_v32 = vcombine.high %v1369_v9, %v1369_v9  ;;  %v1900_v36 = vcombine.high %v1878_v28, %v1878_v28 }
 0x1af   :  { %v5716_v10 = vpop.f32.mrf.mxu1  ;;  %2854 = vperm.xlu0 %5916, %v1116_v4   ;;  %v2258_v51 = vrot.slane %v1878_v28, %v6509_v34 }
 0x1b0   :  { %v1919_v31 = vcombine.high %v1911_v26, %v1911_v26  ;;  %v6512_v37 = vrot.slane %v1911_v26, %v6488_v18  ;;  %v2262_v47 = vrot.slane %v6504_v30, %v6509_v34  ;;  %v1918_v49 = vrot.slane %v1904_v32, %v6488_v18 }
 0x1b1   :  { %v1448_v13 = vpop.f32.mrf.mxu0  ;;  %v2266_v57 = vrot.slane %v1900_v36, %v6509_v34  ;;  %v2575_v6 = vmul.f32 %v2258_v51, %v6534_v55 }
 0x1b2   :  { %v1953_v38 = vcombine.high %v1448_v13, %v1448_v13  ;;  %v1941_v41 = vrot.slane %v1919_v31, %v6488_v18  ;;  %v1960_v39 = vrot.slane %v1448_v13, %v6488_v18  ;;  %v1949_v60 = vcombine.high %v6512_v37, %v6512_v37 }
 0x1b3   :  { %v5723_v14 = vpop.f32.mrf.mxu0  ;;  %5917 = vset.pattern.permute.xlu0 %v7511_v0  ;;  %v2576_v1 = vmul.f32 %v2262_v47, %v6525_v50  ;;  %v6548_v3 = vrot.slane %v1918_v49, %v6488_v18  ;;  %v2577_v11 = vmul.f32 %v2266_v57, %v6543_v63  ;;  %v1920_v13 = vcombine.high %v1918_v49, %v1918_v49  ;;  %v6597_v47 = vld [vmem:[%s7490_s5 + $0x20] sm:$0xff] }
 0x1b4   :  { %2897 = vperm.xlu0 %5917, %v1116_v4   ;;  %v1967_v61 = vrot.slane %v1953_v38, %v6488_v18  ;;  %v2294_v2 = vrot.slane %v1941_v41, %v6509_v34  ;;  %v1968_v4 = vcombine.high %v1960_v39, %v1960_v39  ;;  %v6554_v9 = vrot.slane %v1960_v39, %v6488_v18 }
 0x1b5   :  { %v6485_v16 = vpop.f32.mrf.mxu1  ;;  %v2306_v28 = vrot.slane %v6548_v3, %v6509_v34  ;;  %v1951_v32 = vcombine.high %v1941_v41, %v1941_v41  ;;  %v6602_v41 = vld [vmem:[%s7490_s5 + $0x38] sm:$0xff]  ;;  %v6609_v51 = vrot.slane %v1920_v13, %v6488_v18 }
 0x1b6   :  { %v1969_v14 = vcombine.high %v1967_v61, %v1967_v61  ;;  %v2009_v21 = vrot.slane %v6485_v16, %v6488_v18  ;;  %v6571_v25 = vrot.slane %v1967_v61, %v6488_v18  ;;  %v6574_v26 = vrot.slane %v1968_v4, %v6488_v18 }
 0x1b7   :  { %v5730_v17 = vpop.f32.mrf.mxu1  ;;  %v2646_v61 = vsel %vm2639_vm3, %v2577_v11, 0.0 }
 0x1b8   :  { %5918 = vset.pattern.permute.xlu0 %v5991_v58  ;;  %v1869_v58 = vrot.slane %v1855_v23, %v6488_v18  ;;  %v2298_v17 = vrot.slane %v1949_v60, %v6509_v34  ;;  %v2643_v23 = vsel %vm2639_vm3, %v2576_v1, 0.0  ;;  %v2587_v60 = vmul.f32 %v2306_v28, %v6597_v47 }
 0x1b9   :  { %v6491_v19 = vpop.f32.mrf.mxu0  ;;  %2864 = vperm.xlu0 %5918, %v6479_v7   ;;  %v2290_v1 = vrot.slane %v6512_v37, %v6509_v34 }
 0x1ba   :  { %v1871_v35 = vcombine.high %v1869_v58, %v1869_v58  ;;  %v6518_v48 = vrot.slane %v1869_v58, %v6488_v18  ;;  %v2051_v10 = vcombine.high %v6491_v19, %v6491_v19  ;;  %v2640_v58 = vsel %vm2639_vm3, %v2575_v6, 0.0 }
 0x1bb   :  { %v5737_v20 = vpop.f32.mrf.mxu0 }
 0x1bc   :  { %v6529_v52 = vrot.slane %v1871_v35, %v6488_v18  ;;  %v2274_v8 = vrot.slane %v6518_v48, %v6509_v34  ;;  %v2002_v20 = vcombine.high %v6485_v16, %v6485_v16  ;;  %v2065_v16 = vrot.slane %v2051_v10, %v6488_v18 }
 0x1bd   :  { %v6495_v22 = vpop.f32.mrf.mxu1  ;;  %5919 = vset.pattern.permute.xlu0 %v7511_v0  ;;  %v6584_v35 = vrot.slane %v1969_v14, %v6488_v18  ;;  %v2302_v10 = vrot.slane %v1951_v32, %v6509_v34 }
 0x1be   :  { %v1903_v12 = vcombine.high %v6529_v52, %v6529_v52  ;;  %v2100_v15 = vcombine.high %v6495_v22, %v6495_v22  ;;  %v6588_v36 = vrot.slane %v6495_v22, %v6488_v18  ;;  %v6605_v49 = vrot.slane %v2002_v20, %v6488_v18 }
 0x1bf   :  { %v5744_v24 = vpop.f32.mrf.mxu1  ;;  %v2017_v22 = vcombine.high %v2009_v21, %v2009_v21  ;;  %v2579_v6 = vmul.f32 %v2274_v8, %v6597_v47  ;;  %v6642_v20 = vrot.slane %v2065_v16, %v6488_v18 }
 0x1c0   :  { %v2584_v24 = vmul.f32 %v2294_v2, %v6525_v50  ;;  %v2286_v31 = vrot.slane %v1903_v12, %v6509_v34  ;;  %v6591_v38 = vrot.slane %v2100_v15, %v6488_v18  ;;  %v2067_v2 = vcombine.high %v2065_v16, %v2065_v16 }
 0x1c1   :  { %v6499_v27 = vpop.f32.mrf.mxu0  ;;  %v6621_v12 = vrot.slane %v2009_v21, %v6488_v18  ;;  %v2115_v13 = vcombine.high %v6588_v36, %v6588_v36  ;;  %v6633_v11 = vrot.slane %v6605_v49, %v6488_v18  ;;  %v6636_v8 = vrot.slane %v2017_v22, %v6488_v18  ;;  %v6664_v22 = vld [vmem:[%s7490_s5 + $0x28] sm:$0xff] }
 0x1c2   :  { %v2667_v39 = vsel %vm2639_vm3, %v2584_v24, 0.0  ;;  %v2149_v57 = vcombine.high %v6499_v27, %v6499_v27  ;;  %v2582_v4 = vmul.f32 %v2286_v31, %v6602_v41  ;;  %v6627_v14 = vrot.slane %v6591_v38, %v6488_v18 }
 0x1c3   :  { %v5751_v29 = vpop.f32.mrf.mxu0  ;;  %v2156_v37 = vrot.slane %v6499_v27, %v6488_v18  ;;  %v2676_v27 = vsel %vm2639_vm3, %v2587_v60, 0.0  ;;  %v2583_v24 = vmul.f32 %v2290_v1, %v6534_v55  ;;  %v6655_v28 = vrot.slane %v2067_v2, %v6488_v18 }
 0x1c4   :  { %v6645_v21 = vrot.slane %v2149_v57, %v6488_v18  ;;  %v2661_v16 = vsel %vm2639_vm3, %v2582_v4, 0.0  ;;  %v2652_v31 = vsel %vm2639_vm3, %v2579_v6, 0.0  ;;  %v2434_v57 = vrot.slane %v6627_v14, %v6509_v34 }
 0x1c5   :  { %v6506_v33 = vpop.f32.mrf.mxu1  ;;  %v2116_v60 = vcombine.high %v6591_v38, %v6591_v38  ;;  %v6673_v1 = vrot.slane %v2156_v37, %v6488_v18  ;;  %v2326_v4 = vrot.slane %v6574_v26, %v6509_v34  ;;  %v2146_v56 = vcombine.high %v6627_v14, %v6627_v14 }
 0x1c6   :  { %v6684_v38 = vmul.f32 %v2434_v57, %v6597_v47  ;;  %v7532_v42 = vcombine.high %v6645_v21, %v6645_v21 }
 0x1c7   :  { %v5758_v40 = vpop.f32.mrf.mxu1  ;;  %v2592_v57 = vmul.f32 %v2326_v4, %v6525_v50  ;;  %v2144_v6 = vrot.slane %v2116_v60, %v6488_v18  ;;  %v2442_v14 = vrot.slane %v2146_v56, %v6509_v34 }
 0x1c8   :  { %v2585_v40 = vmul.f32 %v2298_v17, %v6543_v63  ;;  %v2310_v17 = vrot.slane %v6609_v51, %v6509_v34  ;;  %v2193_v53 = vrot.slane %v7532_v42, %v6488_v18 }
 0x1ca   :  { %v2670_v15 = vsel %vm2639_vm3, %v2585_v40, 0.0  ;;  %v2164_v40 = vcombine.high %v2156_v37, %v2156_v37  ;;  %v2588_v2 = vmul.f32 %v2310_v17, %v6664_v22  ;;  %v2205_v37 = vrot.slane %v6506_v33, %v6488_v18 }
 0x1cb   :  { %v6696_v17 = vrot.slane %v6645_v21, %v6488_v18  ;;  %v2470_v42 = vrot.slane %v2193_v53, %v6509_v34 }
 0x1cf   :  { %2644 = vadd.xlane.f32.xlu1 %v2643_v23  ;;  %v6651_v23 = vld [vmem:[%s7490_s5 + $0x18] sm:$0xff] }
 0x1d0   :  { %v2586_v32 = vmul.f32 %v2302_v10, %v6651_v23  ;;  %v2278_v10 = vrot.slane %v6529_v52, %v6509_v34  ;;  %v2186_v52 = vrot.slane %v2164_v40, %v6488_v18  ;;  %v1901_v40 = vcombine.high %v6518_v48, %v6518_v48 }
 0x1d2   :  { %v2673_v29 = vsel %vm2639_vm3, %v2586_v32, 0.0  ;;  %v2454_v48 = vrot.slane %v2186_v52, %v6509_v34  ;;  %v2196_v59 = vcombine.high %v2186_v52, %v2186_v52  ;;  %v1950_v52 = vcombine.high %v6548_v3, %v6548_v3 }
 0x1d3   :  { %2668 = vadd.xlane.f32.xlu1 %v2667_v39  ;;  %v1902_v39 = vcombine.high %v6504_v30, %v6504_v30  ;;  %v2664_v30 = vsel %vm2639_vm3, %v2583_v24, 0.0 }
 0x1d7   :  { %2671 = vadd.xlane.f32.xlu1 %v2670_v15  ;;  %v2099_v15 = vcombine.high %v6655_v28, %v6655_v28 }
 0x1d8   :  { %2641 = vadd.xlane.f32.xlu0 %v2640_v58  ;;  %v2137_v58 = vrot.slane %v2115_v13, %v6488_v18  ;;  %v2198_v13 = vcombine.high %v6506_v33, %v6506_v33  ;;  %v1952_v33 = vcombine.high %v6609_v51, %v6609_v51  ;;  %v2213_v51 = vcombine.high %v2205_v37, %v2205_v37 }
 0x1d9   :  { %v2414_v54 = vrot.slane %v2099_v15, %v6509_v34  ;;  %v6716_v15 = vrot.slane %v2205_v37, %v6488_v18  ;;  %v2148_v37 = vcombine.high %v2144_v6, %v2144_v6 }
 0x1da   :  { %v2147_v24 = vcombine.high %v2137_v58, %v2137_v58  ;;  %v6713_v4 = vrot.slane %v2198_v13, %v6488_v18  ;;  %v2422_v32 = vrot.slane %v2137_v58, %v6509_v34  ;;  %v2580_v13 = vmul.f32 %v2278_v10, %v6664_v22 }
 0x1db   :  { %2677 = vadd.xlane.f32.xlu1 %v2676_v27  ;;  %v2270_v27 = vrot.slane %v1902_v39, %v6509_v34  ;;  %v2282_v10 = vrot.slane %v1901_v40, %v6509_v34 }
 0x1dc   :  { %2647 = vadd.xlane.f32.xlu0 %v2646_v61  ;;  %v2402_v61 = vrot.slane %v6642_v20, %v6509_v34  ;;  %v2430_v39 = vrot.slane %v2147_v24, %v6509_v34  ;;  %v2318_v24 = vrot.slane %v1952_v33, %v6509_v34  ;;  %v6737_v62 = vmul.f32 %v2422_v32, %v6525_v50 }
 0x1dd   :  { %v2578_v60 = vmul.f32 %v2270_v27, %v6651_v23  ;;  %v6741_v58 = vrot.slane %v6713_v4, %v6488_v18  ;;  %v2446_v27 = vrot.slane %v2148_v37, %v6509_v34  ;;  %v2691_v33 = vsel %vm2639_vm3, %v2592_v57, 0.0 }
 0x1de   :  { %v6705_v0 = vmul.f32 %v2402_v61, %v6597_v47  ;;  %v6719_v61 = vmul.f32 %v2414_v54, %v6602_v41  ;;  %v2590_v32 = vmul.f32 %v2318_v24, %v6602_v41  ;;  %v2354_v24 = vrot.slane %v6621_v12, %v6509_v34 }
 0x1df   :  { %2662 = vadd.xlane.f32.xlu1 %v2661_v16  ;;  %v6722_v16 = vmul.f32 %v2430_v39, %v6651_v23  ;;  %v6734_v39 = vmul.f32 %v2454_v48, %v6525_v50  ;;  %v2450_v48 = vrot.slane %v6673_v1, %v6509_v34  ;;  %v2649_v40 = vsel %vm2639_vm3, %v2578_v60, 0.0 }
 0x1e0   :  { %2653 = vadd.xlane.f32.xlu0 %v2652_v31  ;;  %v2438_v31 = vrot.slane %v2144_v6, %v6509_v34  ;;  %v2235_v6 = vrot.slane %v2213_v51, %v6488_v18  ;;  %v6760_v37 = vmul.f32 %v2446_v27, %v6602_v41  ;;  %v2322_v27 = vrot.slane %v6554_v9, %v6509_v34 }
 0x1e1   :  { %v6767_v57 = vmul.f32 %v2450_v48, %v6534_v55 }
 0x1e2   :  { %v6731_v54 = vmul.f32 %v2438_v31, %v6664_v22  ;;  %v6753_v31 = vld [vmem:[%s7490_s5 + $0x30] sm:$0xff]  ;;  %v2245_v48 = vcombine.high %v2235_v6, %v2235_v6 }
 0x1e3   :  { %2674 = vadd.xlane.f32.xlu1 %v2673_v29  ;;  %v2482_v29 = vrot.slane %v6716_v15, %v6509_v34  ;;  %v2581_v60 = vmul.f32 %v2282_v10, %v6753_v31  ;;  %v6800_v3 = vmul.f32 %v2442_v14, %v6753_v31  ;;  %v6818_v14 = vmul.f32 %v2470_v42, %v6664_v22 }
 0x1e4   :  { %2665 = vadd.xlane.f32.xlu0 %v2664_v30  ;;  %v2679_v30 = vsel %vm2639_vm3, %v2588_v2, 0.0  ;;  %v2655_v2 = vsel %vm2639_vm3, %v2580_v13, 0.0  ;;  %v2000_v13 = vcombine.high %v6574_v26, %v6574_v26  ;;  %v2214_v26 = vcombine.high %v6713_v4, %v6713_v4 }
 0x1e5   :  { %v6763_v51 = vmul.f32 %v2482_v29, %v6534_v55  ;;  %v2498_v29 = vrot.slane %v6741_v58, %v6509_v34  ;;  %v2494_v43 = vrot.slane %v2245_v48, %v6509_v34  ;;  %v2658_v4 = vsel %vm2639_vm3, %v2581_v60, 0.0 }
 0x1e6   :  { %v2486_v48 = vrot.slane %v2235_v6, %v6509_v34  ;;  %v2370_v60 = vrot.slane %v6633_v11, %v6509_v34  ;;  %v2242_v6 = vrot.slane %v2214_v26, %v6488_v18  ;;  %v2058_v26 = vrot.slane %v6491_v19, %v6488_v18 }
 0x1e7   :  { %2680 = vadd.xlane.f32.xlu1 %v2679_v30  ;;  %v2462_v30 = vrot.slane %v2196_v59, %v6509_v34  ;;  %v6785_v10 = vmul.f32 %v2498_v29, %v6597_v47  ;;  %v2685_v59 = vsel %vm2639_vm3, %v2590_v32, 0.0  ;;  %v2599_v29 = vmul.f32 %v2354_v24, %v6534_v55 }
 0x1e8   :  { %2650 = vadd.xlane.f32.xlu0 %v2649_v40  ;;  %v2466_v40 = vrot.slane %v6696_v17, %v6509_v34  ;;  %v2334_v32 = vrot.slane %v2000_v13, %v6509_v34  ;;  %v6815_v24 = vmul.f32 %v2494_v43, %v6651_v23  ;;  %v2197_v13 = vcombine.high %v2193_v53, %v2193_v53 }
 0x1e9   :  { %v6797_v56 = vmul.f32 %v2462_v30, %v6651_v23  ;;  %v2314_v30 = vrot.slane %v1950_v52, %v6509_v34  ;;  %v7533_v43 = vcombine.high %v6554_v9, %v6554_v9 }
 0x1ea   :  { %v6805_v21 = vmul.f32 %v2466_v40, %v6597_v47  ;;  %v6830_v40 = vmul.f32 %v2486_v48, %v6525_v50  ;;  %v2478_v53 = vrot.slane %v2197_v13, %v6509_v34  ;;  %v2594_v9 = vmul.f32 %v2334_v32, %v6651_v23 }
 0x1eb   :  { %2692 = vadd.xlane.f32.xlu1 %v2691_v33  ;;  %v2591_v33 = vmul.f32 %v2322_v27, %v6534_v55  ;;  %v2330_v52 = vrot.slane %v7533_v43, %v6509_v34  ;;  %v2502_v48 = vrot.slane %v2242_v6, %v6509_v34 }
 0x1ec   :  { %2656 = vadd.xlane.f32.xlu0 %v2655_v2  ;;  %v2195_v2 = vcombine.high %v6696_v17, %v6696_v17  ;;  %v2712_v17 = vsel %vm2639_vm3, %v2599_v29, 0.0  ;;  %v2244_v29 = vcombine.high %v6741_v58, %v6741_v58  ;;  %v2018_v58 = vcombine.high %v6605_v49, %v6605_v49 }
 0x1ed   :  { %v6855_v32 = vmul.f32 %v2502_v48, %v6664_v22  ;;  %v2593_v43 = vmul.f32 %v2330_v52, %v6543_v63  ;;  %v2066_v52 = vcombine.high %v2058_v26, %v2058_v26 }
 0x1ee   :  { %v2474_v27 = vrot.slane %v2195_v2, %v6509_v34  ;;  %v2589_v2 = vmul.f32 %v2314_v30, %v6753_v31  ;;  %v2506_v13 = vrot.slane %v2244_v29, %v6509_v34  ;;  %v2246_v30 = vcombine.high %v2242_v6, %v2242_v6 }
 0x1ef   :  { %2686 = vadd.xlane.f32.xlu1 %v2685_v59  ;;  %v2001_v59 = vcombine.high %v6584_v35, %v6584_v35  ;;  %v2697_v29 = vsel %vm2639_vm3, %v2594_v9, 0.0  ;;  %v2694_v48 = vsel %vm2639_vm3, %v2593_v43, 0.0  ;;  %v2342_v9 = vrot.slane %v6584_v35, %v6509_v34 }
 0x1f0   :  { %2659 = vadd.xlane.f32.xlu0 %v2658_v4  ;;  %v6836_v42 = vmul.f32 %v2474_v27, %v6753_v31  ;;  %v2688_v4 = vsel %vm2639_vm3, %v2591_v33, 0.0  ;;  %v6848_v27 = vmul.f32 %v2478_v53, %v6602_v41  ;;  %v2603_v33 = vmul.f32 %v2370_v60, %v6597_v47 }
 0x1f1   :  { %v2350_v19 = vrot.slane %v2001_v59, %v6509_v34  ;;  %v6862_v53 = vmul.f32 %v2506_v13, %v6753_v31  ;;  %v2682_v49 = vsel %vm2639_vm3, %v2589_v2, 0.0  ;;  %v2049_v60 = vcombine.high %v6636_v8, %v6636_v8 }
 0x1f2   :  { %v2724_v59 = vsel %vm2639_vm3, %v2603_v33, 0.0  ;;  %v2088_v33 = vrot.slane %v2066_v52, %v6488_v18 }
 0x1f3   :  { %2713 = vadd.xlane.f32.xlu1 %v2712_v17  ;;  %v2338_v17 = vrot.slane %v6571_v25, %v6509_v34  ;;  %v2598_v2 = vmul.f32 %v2350_v19, %v6602_v41  ;;  %v2366_v46 = vrot.slane %v2049_v60, %v6509_v34  ;;  %v2358_v60 = vrot.slane %v6636_v8, %v6509_v34 }
 0x1f4   :  { %2689 = vadd.xlane.f32.xlu0 %v2688_v4  ;;  %v2510_v4 = vrot.slane %v2246_v30, %v6509_v34  ;;  %v2046_v30 = vrot.slane %v2018_v58, %v6488_v18  ;;  %v2390_v58 = vrot.slane %v2088_v33, %v6509_v34 }
 0x1f5   :  { %v2595_v13 = vmul.f32 %v2338_v17, %v6597_v47  ;;  %v2596_v47 = vmul.f32 %v2342_v9, %v6664_v22  ;;  %v2709_v17 = vsel %vm2639_vm3, %v2598_v2, 0.0  ;;  %v2602_v35 = vmul.f32 %v2366_v46, %v6651_v23 }
 0x1f6   :  { %v6870_v6 = vmul.f32 %v2510_v4, %v6602_v41  ;;  %v2374_v19 = vrot.slane %v2046_v30, %v6509_v34  ;;  %v2050_v4 = vcombine.high %v2046_v30, %v2046_v30  ;;  %v2600_v9 = vmul.f32 %v2358_v60, %v6525_v50 }
 0x1f7   :  { %2698 = vadd.xlane.f32.xlu1 %v2697_v29  ;;  %v1999_v29 = vcombine.high %v6571_v25, %v6571_v25  ;;  %v2700_v43 = vsel %vm2639_vm3, %v2595_v13, 0.0  ;;  %v2047_v25 = vcombine.high %v6621_v12, %v6621_v12  ;;  %v2721_v52 = vsel %vm2639_vm3, %v2602_v35, 0.0 }
 0x1f8   :  { %2683 = vadd.xlane.f32.xlu0 %v2682_v49  ;;  %v2604_v46 = vmul.f32 %v2374_v19, %v6664_v22  ;;  %v6900_v13 = vrot.slane %v6588_v36, %v6488_v18  ;;  %v2608_v12 = vmul.f32 %v2390_v58, %v6525_v50  ;;  %v2382_v8 = vrot.slane %v2050_v4, %v6509_v34 }
 0x1f9   :  { %v2346_v49 = vrot.slane %v1999_v29, %v6509_v34  ;;  %v2074_v2 = vrot.slane %v2058_v26, %v6488_v18  ;;  %v2715_v35 = vsel %vm2639_vm3, %v2600_v9, 0.0  ;;  %v2098_v58 = vcombine.high %v2088_v33, %v2088_v33 }
 0x1fa   :  { %v2727_v29 = vsel %vm2639_vm3, %v2604_v46, 0.0  ;;  %v2606_v50 = vmul.f32 %v2382_v8, %v6602_v41  ;;  %v2418_v18 = vrot.slane %v6900_v13, %v6509_v34  ;;  %v2048_v60 = vcombine.high %v6633_v11, %v6633_v11 }
 0x1fb   :  { %2725 = vadd.xlane.f32.xlu1 %v2724_v59  ;;  %v2703_v59 = vsel %vm2639_vm3, %v2596_v47, 0.0  ;;  %v2362_v47 = vrot.slane %v2047_v25, %v6509_v34  ;;  %v2386_v25 = vrot.slane %v2074_v2, %v6509_v34  ;;  %v2096_v41 = vcombine.high %v2074_v2, %v2074_v2 }
 0x1fc   :  { %2695 = vadd.xlane.f32.xlu0 %v2694_v48  ;;  %v2597_v48 = vmul.f32 %v2346_v49, %v6753_v31  ;;  %v2615_v46 = vmul.f32 %v2418_v18, %v6534_v55  ;;  %v2398_v8 = vrot.slane %v2098_v58, %v6509_v34  ;;  %v2378_v11 = vrot.slane %v2048_v60, %v6509_v34 }
 0x1fd   :  { %v2601_v49 = vmul.f32 %v2362_v47, %v6543_v63  ;;  %v2607_v33 = vmul.f32 %v2386_v25, %v6534_v55 }
 0x1fe   :  { %v2605_v55 = vmul.f32 %v2378_v11, %v6753_v31 }
 0x1ff   :  { %2710 = vadd.xlane.f32.xlu1 %v2709_v17  ;;  %v2739_v17 = vsel %vm2639_vm3, %v2608_v12, 0.0  ;;  %v2718_v9 = vsel %vm2639_vm3, %v2601_v49, 0.0 }
 0x200   :  { %2701 = vadd.xlane.f32.xlu0 %v2700_v43  ;;  %v2706_v43 = vsel %vm2639_vm3, %v2597_v48, 0.0  ;;  %v2730_v58 = vsel %vm2639_vm3, %v2605_v55, 0.0 }
 0x203   :  { %2722 = vadd.xlane.f32.xlu1 %v2721_v52 }
 0x204   :  { %2704 = vadd.xlane.f32.xlu0 %v2703_v59  ;;  %v2733_v59 = vsel %vm2639_vm3, %v2606_v50, 0.0 }
 0x206   :  { %v6906_v30 = vpop.f32.mrf.mxu1 }
 0x207   :  { %2728 = vadd.xlane.f32.xlu1 %v2727_v29 }
 0x208   :  { %2707 = vadd.xlane.f32.xlu0 %v2706_v43  ;;  %v5768_v36 = vpop.f32.mrf.mxu1  ;;  %v2394_v43 = vrot.slane %v2096_v41, %v6509_v34 }
 0x209   :  { %v2760_v36 = vsel %vm2639_vm3, %v2615_v46, 0.0  ;;  %v2097_v46 = vcombine.high %v6642_v20, %v6642_v20  ;;  %v2769_v20 = vsel %vm2639_vm3, %v6722_v16, 0.0  ;;  %v2763_v16 = vsel %vm2639_vm3, %v6737_v62, 0.0 }
 0x20a   :  { %v6916_v26 = vpop.f32.mrf.mxu1  ;;  %v6918_v19 = vpop.f32.mrf.mxu0  ;;  %v2609_v60 = vmul.f32 %v2394_v43, %v6543_v63  ;;  %v2784_v62 = vsel %vm2639_vm3, %v6767_v57, 0.0  ;;  %v2820_v57 = vsel %vm2639_vm3, %v6785_v10, 0.0 }
 0x20b   :  { %2740 = vadd.xlane.f32.xlu1 %v2739_v17  ;;  %v2736_v17 = vsel %vm2639_vm3, %v2607_v33, 0.0  ;;  %v2748_v33 = vsel %vm2639_vm3, %v6705_v0, 0.0  ;;  %v2775_v0 = vsel %vm2639_vm3, %v6731_v54, 0.0  ;;  %v2781_v54 = vsel %vm2639_vm3, %v6760_v37, 0.0 }
 0x20c   :  { %2716 = vadd.xlane.f32.xlu0 %v2715_v35  ;;  %v5763_v4 = vpop.f32.mrf.mxu0  ;;  %v5778_v52 = vpop.f32.mrf.mxu1  ;;  %v2610_v35 = vmul.f32 %v2398_v8, %v6651_v23  ;;  %v2772_v23 = vsel %vm2639_vm3, %v6684_v38, 0.0  ;;  %v2742_v41 = vsel %vm2639_vm3, %v2609_v60, 0.0  ;;  %v2410_v38 = vrot.slane %v2097_v46, %v6509_v34 }
 0x20d   :  { %v2778_v37 = vsel %vm2639_vm3, %v6800_v3, 0.0  ;;  %v2796_v3 = vsel %vm2639_vm3, %v6805_v21, 0.0 }
 0x20e   :  { %v6928_v12 = vpop.f32.mrf.mxu0  ;;  %v2745_v25 = vsel %vm2639_vm3, %v2610_v35, 0.0 }
 0x20f   :  { %2734 = vadd.xlane.f32.xlu1 %v2733_v59  ;;  %v2406_v59 = vrot.slane %v6655_v28, %v6509_v34  ;;  %v2145_v28 = vcombine.high %v6900_v13, %v6900_v13  ;;  %v2787_v13 = vsel %vm2639_vm3, %v6734_v39, 0.0  ;;  %v2808_v39 = vsel %vm2639_vm3, %v6763_v51, 0.0 }
 0x210   :  { %v6926_v48 = vpop.f32.mrf.mxu1  ;;  %2719 = vadd.xlane.f32.xlu0 %v2718_v9  ;;  %v5773_v29 = vpop.f32.mrf.mxu0  ;;  %v2757_v9 = vsel %vm2639_vm3, %v6719_v61, 0.0 }
 0x211   :  { %v2612_v8 = vmul.f32 %v2406_v59, %v6664_v22  ;;  %v2613_v29 = vmul.f32 %v2410_v38, %v6753_v31  ;;  %v2426_v61 = vrot.slane %v2145_v28, %v6509_v34  ;;  %v2194_v31 = vcombine.high %v6673_v1, %v6673_v1 }
 0x212   :  { %v5788_v2 = vpop.f32.mrf.mxu1  ;;  %v6941_v50 = vpop.f32.mrf.mxu0  ;;  %v2793_v1 = vsel %vm2639_vm3, %v6797_v56, 0.0  ;;  %v2817_v56 = vsel %vm2639_vm3, %v6815_v24, 0.0  ;;  %v2802_v24 = vsel %vm2639_vm3, %v6836_v42, 0.0 }
 0x213   :  { %2761 = vadd.xlane.f32.xlu1 %v2760_v36  ;;  %v2751_v11 = vsel %vm2639_vm3, %v2612_v8, 0.0  ;;  %v2754_v22 = vsel %vm2639_vm3, %v2613_v29, 0.0  ;;  %v2617_v2 = vmul.f32 %v2426_v61, %v6543_v63  ;;  %v2458_v36 = vrot.slane %v2194_v31, %v6509_v34 }
 0x214   :  { %v6935_v47 = vpop.f32.mrf.mxu1  ;;  %2737 = vadd.xlane.f32.xlu0 %v2736_v17  ;;  %v5783_v49 = vpop.f32.mrf.mxu0  ;;  %v2826_v8 = vsel %vm2639_vm3, %v6862_v53, 0.0 }
 0x215   :  { %v2766_v43 = vsel %vm2639_vm3, %v2617_v2, 0.0  ;;  %v6986_v17 = vpop.permute.xlu0 %2849  ;;  %v2625_v35 = vmul.f32 %v2458_v36, %v6543_v63 }
 0x216   :  { %v5798_v18 = vpop.f32.mrf.mxu1  ;;  %v6946_v4 = vpop.f32.mrf.mxu0 }
 0x217   :  { %2746 = vadd.xlane.f32.xlu1 %v2745_v25  ;;  %v2790_v55 = vsel %vm2639_vm3, %v2625_v35, 0.0  ;;  %v6998_v18 = vpop.permute.xlu1 %2839  ;;  %v2243_v25 = vcombine.high %v6716_v15, %v6716_v15 }
 0x218   :  { %2731 = vadd.xlane.f32.xlu0 %v2730_v58  ;;  %v5793_v52 = vpop.f32.mrf.mxu0  ;;  %v2799_v58 = vsel %vm2639_vm3, %v6818_v14, 0.0 }
 0x219   :  { %v6993_v51 = vpop.permute.xlu0 %2893  ;;  %v2490_v21 = vrot.slane %v2243_v25, %v6509_v34  ;;  %v2805_v34 = vsel %vm2639_vm3, %v6848_v27, 0.0  ;;  %v7071_v25 = vld [vmem:[%s7535_s29] sm:$0xff] }
 0x21b   :  { %2773 = vadd.xlane.f32.xlu1 %v2772_v23  ;;  %v7008_v10 = vpop.permute.xlu1 %2885  ;;  %v2811_v23 = vsel %vm2639_vm3, %v6830_v40, 0.0  ;;  %v2633_v15 = vmul.f32 %v2490_v21, %v6543_v63  ;;  %v7534_v40 = vmov 1   ;;  %v2823_v63 = vsel %vm2639_vm3, %v6855_v32, 0.0 }
 0x21c   :  { %2743 = vadd.xlane.f32.xlu0 %v2742_v41 }
 0x21d   :  { %v7004_v49 = vpop.permute.xlu0 %2881  ;;  %v2814_v59 = vsel %vm2639_vm3, %v2633_v15, 0.0 }
 0x21f   :  { %2758 = vadd.xlane.f32.xlu1 %v2757_v9  ;;  %v7017_v52 = vpop.permute.xlu1 %2834 }
 0x220   :  { %2749 = vadd.xlane.f32.xlu0 %v2748_v33 }
 0x221   :  { %v7012_v60 = vpop.permute.xlu0 %2844 }
 0x223   :  { %2770 = vadd.xlane.f32.xlu1 %v2769_v20  ;;  %v7024_v14 = vpop.permute.xlu1 %2889 }
 0x224   :  { %2752 = vadd.xlane.f32.xlu0 %v2751_v11 }
 0x225   :  { %v7022_v41 = vpop.permute.xlu0 %2901 }
 0x227   :  { %2776 = vadd.xlane.f32.xlu1 %v2775_v0  ;;  %v7032_v46 = vpop.permute.xlu1 %2859 }
 0x228   :  { %2755 = vadd.xlane.f32.xlu0 %v2754_v22 }
 0x22a   :  { %v7028_v42 = vpop.permute.xlu0 %2854 }
 0x22b   :  { %2788 = vadd.xlane.f32.xlu1 %v2787_v13 }
 0x22c   :  { %2764 = vadd.xlane.f32.xlu0 %v2763_v16 }
 0x22f   :  { %2782 = vadd.xlane.f32.xlu1 %v2781_v54  ;;  %v7037_v9 = vpop.permute.xlu0 %2897 }
 0x230   :  { %2767 = vadd.xlane.f32.xlu0 %v2766_v43  ;;  %v2829_v43 = vsel %vm2639_vm3, %v6870_v6, 0.0 }
 0x233   :  { %2809 = vadd.xlane.f32.xlu1 %v2808_v39 }
 0x234   :  { %2785 = vadd.xlane.f32.xlu0 %v2784_v62  ;;  %v7041_v38 = vpop.permute.xlu0 %2864 }
 0x237   :  { %2794 = vadd.xlane.f32.xlu1 %v2793_v1 }
 0x238   :  { %2779 = vadd.xlane.f32.xlu0 %v2778_v37 }
 0x23b   :  { %2821 = vadd.xlane.f32.xlu1 %v2820_v57 }
 0x23c   :  { %2791 = vadd.xlane.f32.xlu0 %v2790_v55 }
 0x23f   :  { %2818 = vadd.xlane.f32.xlu1 %v2817_v56 }
 0x240   :  { %2797 = vadd.xlane.f32.xlu0 %v2796_v3  ;;  %v7066_v3 = vld [vmem:[%s7489_s4] sm:$0xff] }
 0x244   :  { %2800 = vadd.xlane.f32.xlu0 %v2799_v58 }
 0x248   :  { %2803 = vadd.xlane.f32.xlu0 %v2802_v24 }
 0x24c   :  { %2812 = vadd.xlane.f32.xlu0 %v2811_v23 }
 0x250   :  { %2815 = vadd.xlane.f32.xlu0 %v2814_v59  ;;  %2869 = vperm.xlu1 %5914, %v6476_v5  }
 0x254   :  { %2806 = vadd.xlane.f32.xlu0 %v2805_v34  ;;  %5920 = vset.pattern.permute.xlu1 %v7534_v40  ;;  %v2912_v34 = vmul.f32 %v7004_v49, %v7066_v3  ;;  %v2872_v40 = vmul.f32 %v7017_v52, %v7071_v25 }
 0x258   :  { %2824 = vadd.xlane.f32.xlu0 %v2823_v63  ;;  %v2645_v33 = vpop.xlane.xlu1 %2644 }
 0x259   :  { %v2948_v31 = vrot.slane %v2645_v33, %v6435_v44 }
 0x25c   :  { %2827 = vadd.xlane.f32.xlu0 %v2826_v8  ;;  %v2669_v28 = vpop.xlane.xlu1 %2668 }
 0x260   :  { %v2672_v27 = vpop.xlane.xlu1 %2671 }
 0x261   :  { %v2642_v20 = vpop.xlane.xlu0 %2641  ;;  %v3085_v49 = vrot.slane %v2672_v27, %v6435_v44 }
 0x262   :  { %v2944_v13 = vrot.slane %v2642_v20, %v6435_v44  ;;  %v2920_v20 = vadd.f32 %v2912_v34, %v2872_v40  ;;  %v2914_v34 = vmul.f32 %v7024_v14, %v7066_v3 }
 0x264   :  { %v7043_v11 = vpop.xlane.xlu1 %2677  ;;  %v2974_v39 = vsel %vm2973_vm4, %v2948_v31, %v2944_v13 }
 0x265   :  { %v2648_v29 = vpop.xlane.xlu0 %2647 }
 0x266   :  { %v2952_v53 = vrot.slane %v2648_v29, %v6435_v44 }
 0x268   :  { %v2663_v0 = vpop.xlane.xlu1 %2662  ;;  %v2976_v1 = vsel %vm2975_vm5, %v2952_v53, %v2974_v39 }
 0x269   :  { %v2654_v22 = vpop.xlane.xlu0 %2653  ;;  %v2972_v58 = vrot.slane %v2663_v0, %v6435_v44  ;;  %v3081_v0 = vrot.slane %v2669_v28, %v6435_v44  ;;  %v7096_v28 = vld [vmem:[%s7536_s20] sm:$0xff] }
 0x26a   :  { %v2960_v35 = vrot.slane %v2654_v22, %v6435_v44 }
 0x26c   :  { %v2675_v61 = vpop.xlane.xlu1 %2674 }
 0x26d   :  { %v2666_v32 = vpop.xlane.xlu0 %2665 }
 0x26e   :  { %v3077_v29 = vrot.slane %v2666_v32, %v6435_v44  ;;  %v3089_v32 = vrot.slane %v2675_v61, %v6435_v44 }
 0x270   :  { %v7046_v16 = vpop.xlane.xlu1 %2680  ;;  %v3106_v53 = vsel %vm2973_vm4, %v3081_v0, %v3077_v29  ;;  %v7132_v29 = vld [vmem:[%s7489_s4 + $0x8] sm:$0xff]  ;;  %s5967_s4 = scalar_lea.vmem %s5307_s22, 256 }
 0x271   :  { %v2651_v2 = vpop.xlane.xlu0 %2650  ;;  %p5968_p0 = scmp.ne.s32.totalorder %s5307_s22, %s5967_s4  ;;  %p5973_p2 = scmp.lt.s32.totalorder %s5967_s4, %s5967_s4 }
 0x272   :  { %2905 = vperm.xlu0 %5919, %v6479_v7   ;;  %v2956_v54 = vrot.slane %v2651_v2, %v6435_v44 }
 0x273   :  { %p5974_p3 = por %p5973_p2, %p5972_p1 }
 0x274   :  { %v2693_v62 = vpop.xlane.xlu1 %2692  ;;  %2830 = vadd.xlane.f32.xlu1 %v2829_v43  ;;  %v2978_v37 = vsel %vm2977_vm6, %v2956_v54, %v2976_v1  ;;  %v3093_v1 = vrot.slane %v7043_v11, %v6435_v44 }
 0x275   :  { %v2657_v36 = vpop.xlane.xlu0 %2656  ;;  %v2980_v6 = vsel %vm2979_vm7, %v2960_v35, %v2978_v37  ;;  %p5975_p4 = pnand %p5974_p3, %p5968_p0 }
 0x276   :  { %v2964_v7 = vrot.slane %v2657_v36, %v6435_v44 }
 0x278   :  { %v7059_v57 = vpop.xlane.xlu1 %2686  ;;  %v2982_v24 = vsel %vm2981_vm9, %v2964_v7, %v2980_v6 }
 0x279   :  { %v2660_v55 = vpop.xlane.xlu0 %2659  ;;  %v3105_v14 = vrot.slane %v7059_v57, %v6435_v44 }
 0x27a   :  { %v2968_v56 = vrot.slane %v2660_v55, %v6435_v44  ;;  %v3097_v55 = vrot.slane %v7046_v16, %v6435_v44 }
 0x27c   :  { %v2984_v21 = vsel %vm2983_vm8, %v2968_v56, %v2982_v24  ;;  %v7077_v15 = vpop.xlane.xlu1 %2713 }
 0x27d   :  { %v2986_v23 = vsel %vm2985_vm10, %v2972_v58, %v2984_v21  ;;  %v2690_v59 = vpop.xlane.xlu0 %2689  ;;  %v2874_v21 = vmul.f32 %v7012_v60, %v7071_v25 }
 0x27e   :  { %v3060_v63 = vadd.f32 %v6918_v19, %v2986_v23  ;;  %v3107_v19 = vsel %vm2975_vm5, %v3085_v49, %v3106_v53  ;;  %v3203_v31 = vrot.slane %v2690_v59, %v6435_v44  ;;  %v7141_v49 = vld [vmem:[%s7535_s29 + $0x8] sm:$0xff] }
 0x27f   :  { %v3108_v27 = vsel %vm2977_vm6, %v3089_v32, %v3107_v19  ;;  %v2873_v32 = vmul.f32 %v6998_v18, %v7141_v49 }
 0x280   :  { %v2699_v33 = vpop.xlane.xlu1 %2698  ;;  %v3945_v22 = vadd.f32 %v3060_v63, %v2920_v20 }
 0x281   :  { %v2684_v8 = vpop.xlane.xlu0 %2683  ;;  %v3215_v56 = vrot.slane %v2699_v33, %v6435_v44 }
 0x282   :  { %v3953_v52 = vmul.f32 0.35355338, %v3945_v22  ;;  %v3101_v58 = vrot.slane %v2684_v8, %v6435_v44 }
 0x284   :  { %v7086_v13 = vpop.xlane.xlu1 %2725  ;;  %v7103_v36 = vadd.f32 %v3953_v52, %v7096_v28  ;;  %v2922_v52 = vadd.f32 %v2914_v34, %v2874_v21  ;;  %v2915_v34 = vmul.f32 %v6993_v51, %v7132_v29 }
 0x285   :  { %v2696_v2 = vpop.xlane.xlu0 %2695  ;;  %2909 = vperm.xlu1 %5920, %v6476_v5   ;;  %v3207_v5 = vrot.slane %v2693_v62, %v6435_v44  ;;  %v3109_v62 = vsel %vm2979_vm7, %v3093_v1, %v3108_v27 }
 0x286   :  { %v3211_v39 = vrot.slane %v2696_v2, %v6435_v44  ;;  %v3969_v11 = vsel %vm872_vm1, %v7103_v36, -inf  ;;  %v3110_v40 = vsel %vm2981_vm9, %v3097_v55, %v3109_v62 }
 0x287   :  { %v3232_v37 = vsel %vm2973_vm4, %v3207_v5, %v3203_v31  ;;  %v3111_v8 = vsel %vm2983_vm8, %v3101_v58, %v3110_v40 }
 0x288   :  { %v2711_v54 = vpop.xlane.xlu1 %2710  ;;  %v3233_v61 = vsel %vm2975_vm5, %v3211_v39, %v3232_v37  ;;  %v3112_v19 = vsel %vm2985_vm10, %v3105_v14, %v3111_v8  ;;  %v3329_v39 = vrot.slane %v7077_v15, %v6435_v44 }
 0x289   :  { %v2702_v43 = vpop.xlane.xlu0 %2701  ;;  %v3234_v16 = vsel %vm2977_vm6, %v3215_v56, %v3233_v61  ;;  %v3231_v20 = vrot.slane %v2711_v54, %v6435_v44  ;;  %v2913_v54 = vmul.f32 %v7008_v10, %v7132_v29  ;;  %v3186_v1 = vadd.f32 %v6906_v30, %v3112_v19 }
 0x28a   :  { %v3219_v6 = vrot.slane %v2702_v43, %v6435_v44  ;;  %v3345_v30 = vrot.slane %v7086_v13, %v6435_v44  ;;  %v7177_v13 = vld [vmem:[%s7536_s20 + $0x8] sm:$0xff] }
 0x28c   :  { %v2723_v7 = vpop.xlane.xlu1 %2722  ;;  %v3235_v63 = vsel %vm2979_vm7, %v3219_v6, %v3234_v16 }
 0x28d   :  { %v2705_v35 = vpop.xlane.xlu0 %2704  ;;  %v3341_v55 = vrot.slane %v2723_v7, %v6435_v44 }
 0x28e   :  { %v3223_v24 = vrot.slane %v2705_v35, %v6435_v44 }
 0x290   :  { %v2729_v23 = vpop.xlane.xlu1 %2728  ;;  %v3236_v60 = vsel %vm2981_vm9, %v3223_v24, %v3235_v63 }
 0x291   :  { %v2708_v59 = vpop.xlane.xlu0 %2707  ;;  %3970 = vmax.xlane.f32.xlu0 %v3969_v11  ;;  %v3349_v24 = vrot.slane %v2729_v23, %v6435_v44 }
 0x292   :  { %v3227_v33 = vrot.slane %v2708_v59, %v6435_v44  ;;  %v2875_v59 = vmul.f32 %v6986_v17, %v7141_v49 }
 0x294   :  { %v3237_v0 = vsel %vm2983_vm8, %v3227_v33, %v3236_v60  ;;  %v2741_v2 = vpop.xlane.xlu1 %2740  ;;  %v2923_v51 = vadd.f32 %v2915_v34, %v2875_v59 }
 0x295   :  { %v3238_v22 = vsel %vm2985_vm10, %v3231_v20, %v3237_v0  ;;  %v2717_v53 = vpop.xlane.xlu0 %2716 }
 0x296   :  { %v3312_v31 = vadd.f32 %v6928_v12, %v3238_v22  ;;  %v3333_v57 = vrot.slane %v2717_v53, %v6435_v44  ;;  %v2921_v12 = vadd.f32 %v2913_v54, %v2873_v32 }
 0x298   :  { %v3947_v43 = vadd.f32 %v3312_v31, %v2922_v52  ;;  %v2735_v5 = vpop.xlane.xlu1 %2734  ;;  %v3358_v10 = vsel %vm2973_vm4, %v3333_v57, %v3329_v39  ;;  %v3946_v56 = vadd.f32 %v3186_v1, %v2921_v12  ;;  %v3459_v57 = vrot.slane %v2741_v2, %v6435_v44 }
 0x299   :  { %v2720_v27 = vpop.xlane.xlu0 %2719  ;;  %v3357_v63 = vrot.slane %v2735_v5, %v6435_v44 }
 0x29a   :  { %v3337_v37 = vrot.slane %v2720_v27, %v6435_v44  ;;  %v3955_v35 = vmul.f32 0.35355338, %v3947_v43  ;;  %v3954_v16 = vmul.f32 0.35355338, %v3946_v56  ;;  %v2876_v56 = vmul.f32 %v7028_v42, %v7071_v25 }
 0x29c   :  { %v3359_v61 = vsel %vm2975_vm5, %v3337_v37, %v3358_v10  ;;  %v7158_v6 = vadd.f32 %v3955_v35, %v7096_v28  ;;  %v7161_v15 = vpop.xlane.xlu1 %2761  ;;  %v7184_v60 = vadd.f32 %v3954_v16, %v7177_v13 }
 0x29d   :  { %v3360_v18 = vsel %vm2977_vm6, %v3341_v55, %v3359_v61  ;;  %v2738_v62 = vpop.xlane.xlu0 %2737  ;;  %v2916_v55 = vmul.f32 %v7037_v9, %v7066_v3  ;;  %v3581_v59 = vrot.slane %v7161_v15, %v6435_v44 }
 0x29e   :  { %v3975_v58 = vsel %vm872_vm1, %v7158_v6, -inf  ;;  %v3361_v7 = vsel %vm2979_vm7, %v3345_v30, %v3360_v18  ;;  %v3455_v22 = vrot.slane %v2738_v62, %v6435_v44  ;;  %v3972_v19 = vsel %vm872_vm1, %v7184_v60, -inf }
 0x29f   :  { %3976 = vmax.xlane.f32.xlu0 %v3975_v58  ;;  %v3362_v23 = vsel %vm2981_vm9, %v3349_v24, %v3361_v7 }
 0x2a0   :  { %v2747_v11 = vpop.xlane.xlu1 %2746  ;;  %v3484_v32 = vsel %vm2973_vm4, %v3459_v57, %v3455_v22 }
 0x2a1   :  { %v2732_v21 = vpop.xlane.xlu0 %2731  ;;  %v3467_v37 = vrot.slane %v2747_v11, %v6435_v44  ;;  %v2924_v11 = vadd.f32 %v2916_v55, %v2876_v56 }
 0x2a2   :  { %v3353_v40 = vrot.slane %v2732_v21, %v6435_v44 }
 0x2a4   :  { %v3363_v33 = vsel %vm2983_vm8, %v3353_v40, %v3362_v23  ;;  %v2774_v20 = vpop.xlane.xlu1 %2773 }
 0x2a5   :  { %v3364_v8 = vsel %vm2985_vm10, %v3357_v63, %v3363_v33  ;;  %v2744_v17 = vpop.xlane.xlu0 %2743 }
 0x2a6   :  { %v3438_v14 = vadd.f32 %v6916_v26, %v3364_v8  ;;  %v3463_v31 = vrot.slane %v2744_v17, %v6435_v44 }
 0x2a8   :  { %v3948_v0 = vadd.f32 %v3438_v14, %v2923_v51  ;;  %v2759_v53 = vpop.xlane.xlu1 %2758  ;;  %v3485_v39 = vsel %vm2975_vm5, %v3463_v31, %v3484_v32  ;;  %v3597_v14 = vrot.slane %v2774_v20, %v6435_v44  ;;  %v2877_v31 = vmul.f32 %v7032_v46, %v7141_v49 }
 0x2a9   :  { %v2750_v52 = vpop.xlane.xlu0 %2749  ;;  %3973 = vmax.xlane.f32.xlu1 %v3972_v19  ;;  %v3486_v2 = vsel %vm2977_vm6, %v3467_v37, %v3485_v39  ;;  %v3483_v18 = vrot.slane %v2759_v53, %v6435_v44  ;;  %v2917_v19 = vmul.f32 %v7022_v41, %v7132_v29 }
 0x2aa   :  { %v3956_v54 = vmul.f32 0.35355338, %v3948_v0  ;;  %v3471_v5 = vrot.slane %v2750_v52, %v6435_v44 }
 0x2ac   :  { %v7193_v43 = vadd.f32 %v3956_v54, %v7177_v13  ;;  %v2771_v27 = vpop.xlane.xlu1 %2770  ;;  %v3487_v10 = vsel %vm2979_vm7, %v3471_v5, %v3486_v2  ;;  %v2925_v5 = vadd.f32 %v2917_v19, %v2877_v31 }
 0x2ad   :  { %v2753_v26 = vpop.xlane.xlu0 %2752  ;;  %v3593_v23 = vrot.slane %v2771_v27, %v6435_v44 }
 0x2ae   :  { %v3978_v1 = vsel %vm872_vm1, %v7193_v43, -inf  ;;  %v3475_v35 = vrot.slane %v2753_v26, %v6435_v44 }
 0x2af   :  { %3979 = vmax.xlane.f32.xlu0 %v3978_v1 }
 0x2b0   :  { %v3488_v62 = vsel %vm2981_vm9, %v3475_v35, %v3487_v10  ;;  %v2777_v30 = vpop.xlane.xlu1 %2776 }
 0x2b1   :  { %v2756_v12 = vpop.xlane.xlu0 %2755  ;;  %v3601_v53 = vrot.slane %v2777_v30, %v6435_v44 }
 0x2b2   :  { %v3479_v61 = vrot.slane %v2756_v12, %v6435_v44 }
 0x2b4   :  { %v3489_v58 = vsel %vm2983_vm8, %v3479_v61, %v3488_v62  ;;  %v2789_v40 = vpop.xlane.xlu1 %2788 }
 0x2b5   :  { %v3490_v7 = vsel %vm2985_vm10, %v3483_v18, %v3489_v58  ;;  %v2765_v24 = vpop.xlane.xlu0 %2764  ;;  %v3711_v56 = vrot.slane %v2789_v40, %v6435_v44 }
 0x2b6   :  { %v3564_v9 = vadd.f32 %v6941_v50, %v3490_v7  ;;  %v3585_v21 = vrot.slane %v2765_v24, %v6435_v44 }
 0x2b8   :  { %v3949_v16 = vadd.f32 %v3564_v9, %v2924_v11  ;;  %v3610_v33 = vsel %vm2973_vm4, %v3585_v21, %v3581_v59  ;;  %v2783_v0 = vpop.xlane.xlu1 %2782 }
 0x2b9   :  { %v2768_v34 = vpop.xlane.xlu0 %2767  ;;  %v3609_v20 = vrot.slane %v2783_v0, %v6435_v44 }
 0x2ba   :  { %v3589_v63 = vrot.slane %v2768_v34, %v6435_v44  ;;  %v3957_v42 = vmul.f32 0.35355338, %v3949_v16 }
 0x2bc   :  { %v3611_v8 = vsel %vm2975_vm5, %v3589_v63, %v3610_v33  ;;  %v7222_v17 = vadd.f32 %v3957_v42, %v7096_v28  ;;  %v2810_v18 = vpop.xlane.xlu1 %2809 }
 0x2bd   :  { %v3612_v50 = vsel %vm2977_vm6, %v3593_v23, %v3611_v8  ;;  %v2786_v51 = vpop.xlane.xlu0 %2785 }
 0x2be   :  { %v3981_v15 = vsel %vm872_vm1, %v7222_v17, -inf  ;;  %v3613_v22 = vsel %vm2979_vm7, %v3597_v14, %v3612_v50  ;;  %v3707_v62 = vrot.slane %v2786_v51, %v6435_v44  ;;  %v2878_v50 = vmul.f32 %v7041_v38, %v7071_v25 }
 0x2bf   :  { %3982 = vmax.xlane.f32.xlu1 %v3981_v15  ;;  %v3614_v57 = vsel %vm2981_vm9, %v3601_v53, %v3613_v22 }
 0x2c0   :  { %v2795_v58 = vpop.xlane.xlu1 %2794  ;;  %v3736_v7 = vsel %vm2973_vm4, %v3711_v56, %v3707_v62  ;;  %v7537_v56 = vld [vmem:[#allocation7_spill] sm:$0xff] }
 0x2c1   :  { %v2780_v52 = vpop.xlane.xlu0 %2779  ;;  %v3719_v9 = vrot.slane %v2795_v58, %v6435_v44  ;;  %v7540_v58 = vld [vmem:[#allocation5_spill] sm:$0xff] }
 0x2c2   :  { %v3605_v54 = vrot.slane %v2780_v52, %v6435_v44 }
 0x2c4   :  { %v3615_v32 = vsel %vm2983_vm8, %v3605_v54, %v3614_v57  ;;  %v2822_v51 = vpop.xlane.xlu1 %2821  ;;  %v3833_v54 = vrot.slane %v2810_v18, %v6435_v44 }
 0x2c5   :  { %v3616_v26 = vsel %vm2985_vm10, %v3609_v20, %v3615_v32  ;;  %v2792_v39 = vpop.xlane.xlu0 %2791 }
 0x2c6   :  { %v3690_v27 = vadd.f32 %v6926_v48, %v3616_v26  ;;  %v3715_v48 = vrot.slane %v2792_v39, %v6435_v44  ;;  %v3849_v39 = vrot.slane %v2822_v51, %v6435_v44 }
 0x2c8   :  { %v3950_v1 = vadd.f32 %v3690_v27, %v2925_v5  ;;  %v3737_v24 = vsel %vm2975_vm5, %v3715_v48, %v3736_v7  ;;  %v2819_v53 = vpop.xlane.xlu1 %2818 }
 0x2c9   :  { %v2798_v37 = vpop.xlane.xlu0 %2797  ;;  %v3738_v59 = vsel %vm2977_vm6, %v3719_v9, %v3737_v24  ;;  %v3845_v25 = vrot.slane %v2819_v53, %v6435_v44 }
 0x2ca   :  { %v3958_v41 = vmul.f32 0.35355338, %v3950_v1  ;;  %v3723_v11 = vrot.slane %v2798_v37, %v6435_v44 }
 0x2cc   :  { %v7241_v35 = vadd.f32 %v3958_v41, %v7177_v13  ;;  %v3739_v40 = vsel %vm2979_vm7, %v3723_v11, %v3738_v59  ;;  %v2870_v57 = vpop.permute.xlu1 %2869 }
 0x2cd   :  { %v2801_v46 = vpop.xlane.xlu0 %2800 }
 0x2ce   :  { %v3984_v2 = vsel %vm872_vm1, %v7241_v35, -inf  ;;  %v3727_v21 = vrot.slane %v2801_v46, %v6435_v44 }
 0x2cf   :  { %3985 = vmax.xlane.f32.xlu0 %v3984_v2 }
 0x2d0   :  { %v3740_v42 = vsel %vm2981_vm9, %v3727_v21, %v3739_v40 }
 0x2d1   :  { %v2804_v12 = vpop.xlane.xlu0 %2803 }
 0x2d2   :  { %v3731_v16 = vrot.slane %v2804_v12, %v6435_v44  ;;  %v2879_v12 = vmul.f32 %v2870_v57, %v7141_v49  ;;  %v7538_v49 = vld [vmem:[#allocation6_spill] sm:$0xff] }
 0x2d4   :  { %v3741_v23 = vsel %vm2983_vm8, %v3731_v16, %v3740_v42 }
 0x2d5   :  { %v2813_v55 = vpop.xlane.xlu0 %2812 }
 0x2d6   :  { %v3837_v52 = vrot.slane %v2813_v55, %v6435_v44 }
 0x2d8   :  { %v3862_v38 = vsel %vm2973_vm4, %v3837_v52, %v3833_v54 }
 0x2d9   :  { %v2816_v10 = vpop.xlane.xlu0 %2815 }
 0x2da   :  { %v3841_v31 = vrot.slane %v2816_v10, %v6435_v44 }
 0x2dd   :  { %v2807_v61 = vpop.xlane.xlu0 %2806 }
 0x2de   :  { %v3735_v34 = vrot.slane %v2807_v61, %v6435_v44 }
 0x2e0   :  { %v3742_v33 = vsel %vm2985_vm10, %v3735_v34, %v3741_v23 }
 0x2e1   :  { %v2825_v30 = vpop.xlane.xlu0 %2824  ;;  %v3816_v15 = vadd.f32 %v6946_v4, %v3742_v33  ;;  %v3863_v4 = vsel %vm2975_vm5, %v3841_v31, %v3862_v38 }
 0x2e2   :  { %v3864_v32 = vsel %vm2977_vm6, %v3845_v25, %v3863_v4  ;;  %v3853_v26 = vrot.slane %v2825_v30, %v6435_v44 }
 0x2e3   :  { %v3865_v27 = vsel %vm2979_vm7, %v3849_v39, %v3864_v32 }
 0x2e4   :  { %v3866_v37 = vsel %vm2981_vm9, %v3853_v26, %v3865_v27 }
 0x2e5   :  { %v2828_v63 = vpop.xlane.xlu0 %2827 }
 0x2ed   :  { %v2906_v8 = vpop.permute.xlu0 %2905 }
 0x2ee   :  { %v2918_v14 = vmul.f32 %v2906_v8, %v7066_v3 }
 0x2f0   :  { %v2926_v0 = vadd.f32 %v2918_v14, %v2878_v50 }
 0x2f2   :  { %v3951_v22 = vadd.f32 %v3816_v15, %v2926_v0 }
 0x2f4   :  { %v3959_v19 = vmul.f32 0.35355338, %v3951_v22 }
 0x2f6   :  { %v7268_v20 = vadd.f32 %v3959_v19, %v7096_v28  ;;  %v3857_v28 = vrot.slane %v2828_v63, %v6435_v44 }
 0x2f8   :  { %v3987_v3 = vsel %vm872_vm1, %v7268_v20, -inf  ;;  %v3867_v41 = vsel %vm2983_vm8, %v3857_v28, %v3866_v37  ;;  %v7544_v37 = vld [vmem:[#allocation11_spill] sm:$0xff] }
 0x2f9   :  { %3988 = vmax.xlane.f32.xlu1 %v3987_v3 }
 0x2fd   :  { %v2831_v5 = vpop.xlane.xlu1 %2830 }
 0x2fe   :  { %v3861_v1 = vrot.slane %v2831_v5, %v6435_v44 }
 0x300   :  { %v3868_v46 = vsel %vm2985_vm10, %v3861_v1, %v3867_v41 }
 0x301   :  { %v2910_v2 = vpop.permute.xlu1 %2909  ;;  %v3942_v10 = vadd.f32 %v6935_v47, %v3868_v46  ;;  %v7539_v47 = vld [vmem:[#allocation8_spill] sm:$0xff] }
 0x302   :  { %v2919_v55 = vmul.f32 %v2910_v2, %v7132_v29 }
 0x304   :  { %v2927_v61 = vadd.f32 %v2919_v55, %v2879_v12 }
 0x306   :  { %v3952_v18 = vadd.f32 %v3942_v10, %v2927_v61 }
 0x308   :  { %v3960_v62 = vmul.f32 0.35355338, %v3952_v18 }
 0x30a   :  { %4057 = vrot.lane.b32.xlu1 %v6272_v45, %s5995_s23  ;;  %v3968_v44 = vadd.f32 %v3960_v62, %v7177_v13  ;;  %v7541_v13 = vld [vmem:[#allocation9_spill] sm:$0xff] }
 0x30c   :  { %v3990_v48 = vsel %vm872_vm1, %v3968_v44, -inf }
 0x30d   :  { %3991 = vmax.xlane.f32.xlu0 %v3990_v48 }
 0x30e   :  { %4209 = vrot.lane.b32.xlu1 %v7537_v56, %s5995_s23 }
 0x312   :  { %4285 = vrot.lane.b32.xlu1 %v7538_v49, %s5995_s23 }
 0x316   :  { %4437 = vrot.lane.b32.xlu1 %v7539_v47, %s5995_s23 }
 0x31a   :  { %v3971_v29 = vpop.xlane.xlu0 %3970 }
 0x31b   :  { %v3993_v30 = vsub.f32 %v7103_v36, %v3971_v29 }
 0x31d   :  { %v4001_v45 = vmul.f32 1.442695, %v3993_v30 }
 0x31f   :  { %5921 = vpow2.f32 %v4001_v45 }
 0x323   :  { %4133 = vrot.lane.b32.xlu0 %v7540_v58, %s5995_s23 }
 0x327   :  { %4361 = vrot.lane.b32.xlu0 %v7541_v13, %s5995_s23 }
 0x328   :  { %v3977_v7 = vpop.xlane.xlu0 %3976 }
 0x329   :  { %v3995_v24 = vsub.f32 %v7158_v6, %v3977_v7 }
 0x32b   :  { %v4005_v11 = vmul.f32 1.442695, %v3995_v24 }
 0x32c   :  { %v7304_v16 = vpop.eup %5921 }
 0x32d   :  { %5923 = vpow2.f32 %v4005_v11  ;;  %v4017_v63 = vsel %vm872_vm1, %v7304_v16, 0.0  ;;  %v4666_v11 = vld [vmem:[%s7497_s12 + $0x8] sm:$0xff] }
 0x332   :  { %v3974_v9 = vpop.xlane.xlu1 %3973 }
 0x333   :  { %v3994_v21 = vsub.f32 %v7184_v60, %v3974_v9 }
 0x335   :  { %v4003_v59 = vmul.f32 1.442695, %v3994_v21 }
 0x337   :  { %5925 = vpow2.f32 %v4003_v59 }
 0x338   :  { %v3980_v36 = vpop.xlane.xlu0 %3979 }
 0x339   :  { %v3996_v34 = vsub.f32 %v7193_v43, %v3980_v36 }
 0x33a   :  { %v7309_v40 = vpop.eup %5923  ;;  %4018 = vadd.xlane.f32.xlu1 %v4017_v63 }
 0x33b   :  { %v4007_v42 = vmul.f32 1.442695, %v3996_v34  ;;  %v4023_v6 = vsel %vm872_vm1, %v7309_v40, 0.0  ;;  %v4667_v34 = vld [vmem:[%s7497_s12 + $0x10] sm:$0xff] }
 0x33d   :  { %5927 = vpow2.f32 %v4007_v42  ;;  %v4668_v42 = vld [vmem:[%s7497_s12 + $0x18] sm:$0xff] }
 0x33e   :  { %4024 = vadd.xlane.f32.xlu1 %v4023_v6 }
 0x344   :  { %v7313_v60 = vpop.eup %5925 }
 0x345   :  { %v4020_v23 = vsel %vm872_vm1, %v7313_v60, 0.0 }
 0x346   :  { %4021 = vadd.xlane.f32.xlu0 %v4020_v23 }
 0x348   :  { %v3983_v33 = vpop.xlane.xlu1 %3982 }
 0x349   :  { %v3997_v43 = vsub.f32 %v7222_v17, %v3983_v33 }
 0x34a   :  { %v7318_v8 = vpop.eup %5927 }
 0x34b   :  { %v4009_v50 = vmul.f32 1.442695, %v3997_v43  ;;  %v4026_v51 = vsel %vm872_vm1, %v7318_v8, 0.0 }
 0x34c   :  { %4027 = vadd.xlane.f32.xlu0 %v4026_v51 }
 0x34d   :  { %5929 = vpow2.f32 %v4009_v50 }
 0x358   :  { %v3986_v14 = vpop.xlane.xlu0 %3985 }
 0x359   :  { %v3998_v15 = vsub.f32 %v7241_v35, %v3986_v14  ;;  %v7542_v35 = vmov 0.0  }
 0x35a   :  { %v7323_v0 = vpop.eup %5929 }
 0x35b   :  { %v4011_v22 = vmul.f32 1.442695, %v3998_v15  ;;  %v4029_v53 = vsel %vm872_vm1, %v7323_v0, 0.0 }
 0x35c   :  { %4030 = vadd.xlane.f32.xlu1 %v4029_v53 }
 0x35d   :  { %5931 = vpow2.f32 %v4011_v22 }
 0x36a   :  { %v7327_v17 = vpop.eup %5931 }
 0x36b   :  { %v4032_v52 = vsel %vm872_vm1, %v7327_v17, 0.0 }
 0x36c   :  { %4033 = vadd.xlane.f32.xlu0 %v4032_v52 }
 0x382   :  { %v3989_v19 = vpop.xlane.xlu1 %3988 }
 0x383   :  { %v3999_v31 = vsub.f32 %v7268_v20, %v3989_v19  ;;  %v7543_v20 = vld [vmem:[#allocation10_spill] sm:$0xff] }
 0x385   :  { %v4013_v54 = vmul.f32 1.442695, %v3999_v31 }
 0x386   :  { %v4058_v38 = vpop.permute.xlu1 %4057 }
 0x387   :  { %5933 = vpow2.f32 %v4013_v54  ;;  %5800 = vmatpush3.msra.mxu0 %v4058_v38 }
 0x388   :  { %5809 = vmatprep.subr.mxu0 %v7542_v35 }
 0x38a   :  { %v4210_v5 = vpop.permute.xlu1 %4209 }
 0x38e   :  { %v4286_v27 = vpop.permute.xlu1 %4285 }
 0x392   :  { %v4438_v1 = vpop.permute.xlu1 %4437 }
 0x394   :  { %v7333_v3 = vpop.eup %5933 }
 0x395   :  { %v4035_v4 = vsel %vm872_vm1, %v7333_v3, 0.0 }
 0x396   :  { %4036 = vadd.xlane.f32.xlu1 %v4035_v4  ;;  %v3992_v25 = vpop.xlane.xlu0 %3991 }
 0x397   :  { %v4000_v57 = vsub.f32 %v3968_v44, %v3992_v25 }
 0x399   :  { %v4015_v32 = vmul.f32 1.442695, %v4000_v57 }
 0x39a   :  { %v4134_v26 = vpop.permute.xlu0 %4133 }
 0x39b   :  { %5935 = vpow2.f32 %v4015_v32  ;;  %5805 = vmatpush3.msra.mxu1 %v4134_v26 }
 0x39c   :  { %5814 = vmatprep.subr.mxu1 %v7542_v35 }
 0x39e   :  { %v4362_v2 = vpop.permute.xlu0 %4361 }
 0x3a7   :  { %4589 = vrot.lane.b32.xlu1 %v7543_v20, %s5995_s23 }
 0x3a8   :  { %v7340_v39 = vpop.eup %5935 }
 0x3a9   :  { %v4038_v28 = vsel %vm872_vm1, %v7340_v39, 0.0 }
 0x3aa   :  { %4039 = vadd.xlane.f32.xlu0 %v4038_v28 }
 0x3c0   :  { %4513 = vrot.lane.b32.xlu0 %v7544_v37, %s5995_s23 }
 0x3c3   :  { %v4019_v41 = vpop.xlane.xlu1 %4018 }
 0x3c4   :  { %5937 = vrcp.f32 %v4019_v41 }
 0x3c7   :  { %v4025_v46 = vpop.xlane.xlu1 %4024 }
 0x3c8   :  { %5939 = vrcp.f32 %v4025_v46 }
 0x3cf   :  { %v4022_v12 = vpop.xlane.xlu0 %4021 }
 0x3d0   :  { %5941 = vrcp.f32 %v4022_v12 }
 0x3d1   :  { %v5938_v55 = vpop.eup %5937 }
 0x3d2   :  { %v4049_v10 = vmul.f32 %v5938_v55, %v7304_v16  ;;  %v4665_v16 = vld [vmem:[%s7497_s12] sm:$0xff]  ;;  %v5965_v55 = vld [vmem:[%s7523_s21 + $0x8] sm:$0xff] }
 0x3d4   :  { %5802 = vmatmul.mubr.msk.f32.vlgmr.msra.gmra.mxu0 %vm872_vm1, %v4049_v10 }
 0x3d5   :  { %v5940_v61 = vpop.eup %5939  ;;  %5810 = vmatpush3.msra.mxu0 %v4210_v5  ;;  %v4028_v18 = vpop.xlane.xlu0 %4027  ;;  %5811 = vmatprep.mubr.msk.f32.mxu0 %vm5992_vm2, %v7542_v35 }
 0x3d6   :  { %5943 = vrcp.f32 %v4028_v18  ;;  %5819 = vmatprep.subr.mxu0 %v7542_v35  ;;  %v4051_v62 = vmul.f32 %v5940_v61, %v7309_v40  ;;  %v5966_v18 = vld [vmem:[%s7523_s21] sm:$0xff] }
 0x3d8   :  { %5812 = vmatmul.mubr.msk.f32.vlgmr.msra.gmra.mxu0 %vm872_vm1, %v4051_v62 }
 0x3d9   :  { %5820 = vmatpush3.msra.mxu0 %v4362_v2  ;;  %5821 = vmatprep.mubr.msk.f32.mxu0 %vm5992_vm2, %v7542_v35 }
 0x3da   :  { %5829 = vmatprep.subr.mxu0 %v7542_v35 }
 0x3dd   :  { %v5942_v44 = vpop.eup %5941 }
 0x3de   :  { %v4050_v48 = vmul.f32 %v5942_v44, %v7313_v60 }
 0x3e0   :  { %5807 = vmatmul.mubr.msk.f32.vlgmr.msra.gmra.mxu1 %vm872_vm1, %v4050_v48 }
 0x3e1   :  { %5815 = vmatpush3.msra.mxu1 %v4286_v27  ;;  %5816 = vmatprep.mubr.msk.f32.mxu1 %vm5992_vm2, %v7542_v35 }
 0x3e2   :  { %5824 = vmatprep.subr.mxu1 %v7542_v35 }
 0x3e3   :  { %v5944_v56 = vpop.eup %5943 }
 0x3e4   :  { %v4052_v49 = vmul.f32 %v5944_v56, %v7318_v8 }
 0x3e5   :  { %v4031_v47 = vpop.xlane.xlu1 %4030 }
 0x3e6   :  { %5945 = vrcp.f32 %v4031_v47  ;;  %5817 = vmatmul.mubr.msk.f32.vlgmr.msra.gmra.mxu1 %vm872_vm1, %v4052_v49 }
 0x3e7   :  { %5825 = vmatpush3.msra.mxu1 %v4438_v1  ;;  %5826 = vmatprep.mubr.msk.f32.mxu1 %vm5992_vm2, %v7542_v35 }
 0x3e8   :  { %5834 = vmatprep.subr.mxu1 %v7542_v35 }
 0x3f3   :  { %v5946_v29 = vpop.eup %5945 }
 0x3f4   :  { %v4053_v30 = vmul.f32 %v5946_v29, %v7323_v0 }
 0x3f5   :  { %v4034_v58 = vpop.xlane.xlu0 %4033 }
 0x3f6   :  { %5947 = vrcp.f32 %v4034_v58  ;;  %5822 = vmatmul.mubr.msk.f32.vlgmr.msra.gmra.mxu0 %vm872_vm1, %v4053_v30 }
 0x3f7   :  { %5831 = vmatprep.mubr.msk.f32.mxu0 %vm5992_vm2, %v7542_v35 }
 0x403   :  { %v5948_v45 = vpop.eup %5947 }
 0x404   :  { %v4054_v13 = vmul.f32 %v5948_v45, %v7327_v17 }
 0x406   :  { %5827 = vmatmul.mubr.msk.f32.vlgmr.msra.gmra.mxu1 %vm872_vm1, %v4054_v13 }
 0x407   :  { %5836 = vmatprep.mubr.msk.f32.mxu1 %vm5992_vm2, %v7542_v35 }
 0x41f   :  { %v4037_v7 = vpop.xlane.xlu1 %4036 }
 0x420   :  { %5949 = vrcp.f32 %v4037_v7 }
 0x423   :  { %v4590_v24 = vpop.permute.xlu1 %4589 }
 0x424   :  { %5835 = vmatpush3.msra.mxu1 %v4590_v24 }
 0x425   :  { %5844 = vmatprep.subr.mxu1 %v4666_v11 }
 0x42d   :  { %v5950_v21 = vpop.eup %5949 }
 0x42e   :  { %v4055_v36 = vmul.f32 %v5950_v21, %v7333_v3  ;;  %v5051_v21 = vld [vmem:[%s7499_s14 + $0x8] sm:$0xff] }
 0x433   :  { %v4040_v9 = vpop.xlane.xlu0 %4039 }
 0x434   :  { %5951 = vrcp.f32 %v4040_v9  ;;  %v5052_v9 = vld [vmem:[%s7499_s14 + $0x10] sm:$0xff] }
 0x437   :  { %v4514_v59 = vpop.permute.xlu0 %4513 }
 0x438   :  { %5830 = vmatpush3.msra.mxu0 %v4514_v59 }
 0x439   :  { %5832 = vmatmul.mubr.msk.f32.vlgmr.msra.gmra.mxu0 %vm872_vm1, %v4055_v36  ;;  %5839 = vmatprep.subr.mxu0 %v4665_v16 }
 0x43a   :  { %5840 = vmatpush3.msra.mxu0 %v4665_v16  ;;  %v5050_v16 = vld [vmem:[%s7499_s14] sm:$0xff] }
 0x43b   :  { %5849 = vmatprep.subr.mxu0 %v4667_v34 }
 0x441   :  { %v5952_v63 = vpop.eup %5951 }
 0x442   :  { %v4056_v40 = vmul.f32 %v5952_v63, %v7340_v39 }
 0x444   :  { %5837 = vmatmul.mubr.msk.f32.vlgmr.msra.gmra.mxu1 %vm872_vm1, %v4056_v40 }
 0x445   :  { %5845 = vmatpush3.msra.mxu1 %v4666_v11  ;;  %v5053_v11 = vld [vmem:[%s7499_s14 + $0x18] sm:$0xff] }
 0x446   :  { %5854 = vmatprep.subr.mxu1 %v4668_v42 }
 0x494   :  { %v4129_v6 = vpop.f32.mrf.mxu0 }
 0x495   :  { %5841 = vmatprep.mubr.msk.f32.mxu0 %vm872_vm1, %v4129_v6 }
 0x496   :  { %v5803_v60 = vpop.f32.mrf.mxu0 }
 0x497   :  { %v5421_v60 = vld [vmem:[%s7498_s13] ss:$0 sm:$0xff] }
 0x498   :  { %v4281_v23 = vpop.f32.mrf.mxu0 }
 0x499   :  { %5846 = vmatprep.mubr.msk.f32.mxu1 %vm872_vm1, %v4281_v23 }
 0x49a   :  { %v5813_v33 = vpop.f32.mrf.mxu0 }
 0x49b   :  { %v5422_v33 = vld [vmem:[%s7498_s13 + $0x1] ss:$0 sm:$0xff] }
 0x4a0   :  { %v4205_v43 = vpop.f32.mrf.mxu1 }
 0x4a1   :  { %5842 = vmatmul.mubr.msk.f32.vlgmr.msra.gmra.mxu0 %vm872_vm1, %v4205_v43 }
 0x4a2   :  { %v5808_v8 = vpop.f32.mrf.mxu1  ;;  %5850 = vmatpush3.msra.mxu0 %v4667_v34 }
 0x4a3   :  { %5859 = vmatprep.subr.mxu0 %v5053_v11 }
 0x4a6   :  { %v4357_v50 = vpop.f32.mrf.mxu1 }
 0x4a7   :  { %5847 = vmatmul.mubr.msk.f32.vlgmr.msra.gmra.mxu1 %vm872_vm1, %v4357_v50 }
 0x4a8   :  { %v5818_v51 = vpop.f32.mrf.mxu1  ;;  %5855 = vmatpush3.msra.mxu1 %v4668_v42 }
 0x4b6   :  { %v4433_v14 = vpop.f32.mrf.mxu0 }
 0x4b7   :  { %5851 = vmatprep.mubr.msk.f32.mxu0 %vm872_vm1, %v4433_v14 }
 0x4b8   :  { %v5823_v15 = vpop.f32.mrf.mxu0 }
 0x4c6   :  { %v4509_v0 = vpop.f32.mrf.mxu1 }
 0x4c7   :  { %5852 = vmatmul.mubr.msk.f32.vlgmr.msra.gmra.mxu0 %vm872_vm1, %v4509_v0  ;;  %v5167_v0 = vld [vmem:[%s7501_s16 + $0x38] sm:$0xff] }
 0x4c8   :  { %v5828_v22 = vpop.f32.mrf.mxu1  ;;  %5860 = vmatpush3.msra.mxu0 %v5053_v11  ;;  %5870 = vmatprep.subr.mxu1 %v5167_v0 }
 0x4c9   :  { %5861 = vmatprep.subr.mxu0 %v5052_v9  ;;  %v5166_v22 = vld [vmem:[%s7501_s16 + $0x30] sm:$0xff] }
 0x4ca   :  { %5862 = vmatpush3.msra.mxu0 %v5052_v9 }
 0x4cb   :  { %5863 = vmatprep.subr.mxu0 %v5051_v21 }
 0x4cc   :  { %5864 = vmatpush3.msra.mxu0 %v5051_v21 }
 0x4cd   :  { %5865 = vmatprep.subr.mxu0 %v5050_v16 }
 0x4ce   :  { %5866 = vmatpush3.msra.mxu0 %v5050_v16 }
 0x4f9   :  { %v4585_v53 = vpop.f32.mrf.mxu0 }
 0x4fa   :  { %5856 = vmatprep.mubr.msk.f32.mxu1 %vm872_vm1, %v4585_v53  ;;  %v5165_v53 = vld [vmem:[%s7501_s16 + $0x28] sm:$0xff] }
 0x4fb   :  { %v5833_v17 = vpop.f32.mrf.mxu0 }
 0x4fc   :  { %v5164_v17 = vld [vmem:[%s7501_s16 + $0x20] sm:$0xff] }
 0x504   :  { %v4661_v52 = vpop.f32.mrf.mxu1 }
 0x505   :  { %5857 = vmatmul.mubr.msk.f32.vlgmr.msra.gmra.mxu1 %vm872_vm1, %v4661_v52  ;;  %v5163_v52 = vld [vmem:[%s7501_s16 + $0x18] sm:$0xff] }
 0x506   :  { %v5838_v19 = vpop.f32.mrf.mxu1  ;;  %5871 = vmatpush3.msra.mxu1 %v5167_v0 }
 0x507   :  { %5872 = vmatprep.subr.mxu1 %v5166_v22  ;;  %v5162_v19 = vld [vmem:[%s7501_s16 + $0x10] sm:$0xff] }
 0x508   :  { %5873 = vmatpush3.msra.mxu1 %v5166_v22 }
 0x509   :  { %5874 = vmatprep.subr.mxu1 %v5165_v53 }
 0x50a   :  { %5875 = vmatpush3.msra.mxu1 %v5165_v53 }
 0x50b   :  { %5876 = vmatprep.subr.mxu1 %v5164_v17 }
 0x50c   :  { %5877 = vmatpush3.msra.mxu1 %v5164_v17 }
 0x50d   :  { %5878 = vmatprep.subr.mxu1 %v5163_v52 }
 0x50e   :  { %5879 = vmatpush3.msra.mxu1 %v5163_v52 }
 0x50f   :  { %5880 = vmatprep.subr.mxu1 %v5162_v19 }
 0x510   :  { %5881 = vmatpush3.msra.mxu1 %v5162_v19 }
 0x561   :  { %v5843_v31 = vpop.f32.mrf.mxu0 }
 0x562   :  { %v5000_v57 = vsel %vm85_vm0, %v5843_v31, 0.0  ;;  %v5161_v31 = vld [vmem:[%s7501_s16 + $0x8] sm:$0xff] }
 0x563   :  { %v4741_v54 = vpop.f32.mrf.mxu0  ;;  %5882 = vmatprep.subr.mxu1 %v5161_v31 }
 0x564   :  { %v4993_v39 = vsel %vm85_vm0, %v4741_v54, 0.0  ;;  %v5160_v54 = vld [vmem:[%s7501_s16] sm:$0xff]  ;;  %5883 = vmatpush3.msra.mxu1 %v5161_v31 }
 0x565   :  { %5884 = vmatprep.subr.mxu1 %v5160_v54 }
 0x566   :  { %5885 = vmatpush3.msra.mxu1 %v5160_v54 }
 0x567   :  { %v5848_v38 = vpop.f32.mrf.mxu1 }
 0x568   :  { %v5001_v4 = vsel %vm85_vm0, %v5848_v38, 0.0  ;;  %v5423_v38 = vld [vmem:[%s7500_s15] ss:$0 sm:$0xff] }
 0x569   :  { %v4822_v3 = vpop.f32.mrf.mxu1  ;;  %v5002_v20 = vadd.f32 %v5001_v4, %v5000_v57 }
 0x56a   :  { %v4994_v32 = vsel %vm85_vm0, %v4822_v3, 0.0 }
 0x56b   :  { %v4995_v5 = vadd.f32 %v4994_v32, %v4993_v39 }
 0x587   :  { %v5853_v35 = vpop.f32.mrf.mxu0 }
 0x588   :  { %v5003_v26 = vsel %vm85_vm0, %v5853_v35, 0.0 }
 0x589   :  { %v4903_v25 = vpop.f32.mrf.mxu0  ;;  %v5004_v27 = vadd.f32 %v5003_v26, %v5002_v20 }
 0x58a   :  { %v4996_v28 = vsel %vm85_vm0, %v4903_v25, 0.0 }
 0x58b   :  { %v4997_v41 = vadd.f32 %v4996_v28, %v4995_v5 }
 0x5c5   :  { %v5858_v1 = vpop.f32.mrf.mxu1 }
 0x5c6   :  { %v5005_v37 = vsel %vm85_vm0, %v5858_v1, 0.0 }
 0x5c7   :  { %v5006_v46 = vadd.f32 %v5005_v37, %v5004_v27  ;;  %v4984_v2 = vpop.f32.mrf.mxu1 }
 0x5c8   :  { %v4998_v12 = vsel %vm85_vm0, %v4984_v2, 0.0 }
 0x5c9   :  { %v5008_v10 = vadd.f32 %v5965_v55, %v5006_v46  ;;  %v4999_v61 = vadd.f32 %v4998_v12, %v4997_v41 }
 0x5cb   :  { %v5007_v62 = vadd.f32 %v5966_v18, %v4999_v61  ;;  %v5014_v44 = vsel %vm85_vm0, %v5008_v10, 0.0 }
 0x5cc   :  { %5015 = vadd.xlane.f32.xlu1 %v5014_v44 }
 0x5cd   :  { %v5011_v48 = vsel %vm85_vm0, %v5007_v62, 0.0 }
 0x5ce   :  { %5012 = vadd.xlane.f32.xlu0 %v5011_v48 }
 0x655   :  { %v5016_v56 = vpop.xlane.xlu1 %5015 }
 0x656   :  { %v5019_v49 = vmul.f32 0.03125, %v5016_v56 }
 0x657   :  { %v5013_v47 = vpop.xlane.xlu0 %5012 }
 0x658   :  { %v5018_v29 = vmul.f32 0.03125, %v5013_v47  ;;  %v5021_v30 = vsub.f32 %v5008_v10, %v5019_v49 }
 0x65a   :  { %v5020_v58 = vsub.f32 %v5007_v62, %v5018_v29  ;;  %v5023_v7 = vmul.f32 %v5021_v30, %v5021_v30  ;;  %v5426_v62 = vld [vmem:[%s7502_s17] ss:$0 sm:$0xff] }
 0x65c   :  { %v5022_v45 = vmul.f32 %v5020_v58, %v5020_v58  ;;  %v5027_v24 = vsel %vm85_vm0, %v5023_v7, 0.0 }
 0x65e   :  { %v5024_v13 = vsel %vm85_vm0, %v5022_v45, 0.0 }
 0x65f   :  { %5025 = vadd.xlane.f32.xlu0 %v5024_v13 }
 0x663   :  { %5028 = vadd.xlane.f32.xlu0 %v5027_v24 }
 0x6e8   :  { %v5026_v59 = vpop.xlane.xlu0 %5025 }
 0x6e9   :  { %v5030_v36 = vmul.f32 0.03125, %v5026_v59 }
 0x6eb   :  { %v5032_v34 = vadd.f32 1e-12, %v5030_v36 }
 0x6ec   :  { %v5029_v63 = vpop.xlane.xlu0 %5028 }
 0x6ed   :  { %5953 = vrsqrt.f32 %v5032_v34  ;;  %v5031_v40 = vmul.f32 0.03125, %v5029_v63 }
 0x6ef   :  { %v5033_v42 = vadd.f32 1e-12, %v5031_v40 }
 0x6f1   :  { %5955 = vrsqrt.f32 %v5033_v42 }
 0x6fa   :  { %v5954_v6 = vpop.eup %5953 }
 0x6fb   :  { %v5036_v23 = vmul.f32 %v5954_v6, %v5020_v58 }
 0x6fd   :  { %v5042_v43 = vmul.f32 %v5421_v60, %v5036_v23 }
 0x6fe   :  { %v5956_v8 = vpop.eup %5955 }
 0x6ff   :  { %v5037_v50 = vmul.f32 %v5956_v8, %v5021_v30  ;;  %v7434_v51 = vadd.f32 %v5422_v33, %v5042_v43 }
 0x701   :  { %v5043_v14 = vmul.f32 %v5421_v60, %v5037_v50  ;;  %5867 = vmatprep.mubr.msk.f32.mxu0 %vm85_vm0, %v7434_v51  ;;  %v5430_v50 = vld [vmem:[%s7503_s18 + $0x1] ss:$0 sm:$0xff] }
 0x703   :  { %v5049_v15 = vadd.f32 %v5422_v33, %v5043_v14  ;;  %v5429_v33 = vld [vmem:[%s7503_s18] ss:$0 sm:$0xff] }
 0x705   :  { %5868 = vmatmul.mubr.msk.f32.vlgmr.msra.gmra.mxu0 %vm85_vm0, %v5049_v15 }
 0x7c5   :  { %v5869_v35 = vpop.f32.mrf.mxu0 }
 0x7c6   :  { %v5139_v3 = vadd.f32 %v5869_v35, %v5423_v38 }
 0x7c7   :  { %v5133_v4 = vpop.f32.mrf.mxu0 }
 0x7c8   :  { %v5145_v25 = vmul.f32 %v5139_v3, %v5139_v3  ;;  %v5134_v57 = vadd.f32 %v5423_v38, %v5133_v4  ;;  %v5143_v10 = vmul.f32 0.5, %v5139_v3 }
 0x7ca   :  { %v5147_v32 = vmul.f32 %v5145_v25, %v5139_v3  ;;  %v5144_v26 = vmul.f32 %v5134_v57, %v5134_v57  ;;  %v5142_v12 = vmul.f32 0.5, %v5134_v57 }
 0x7cc   :  { %v5149_v20 = vmul.f32 0.044715, %v5147_v32  ;;  %v5146_v39 = vmul.f32 %v5144_v26, %v5134_v57 }
 0x7ce   :  { %v5151_v28 = vadd.f32 %v5149_v20, %v5139_v3  ;;  %v5148_v5 = vmul.f32 0.044715, %v5146_v39 }
 0x7d0   :  { %v5153_v27 = vmul.f32 0.7978846, %v5151_v28  ;;  %v5150_v1 = vadd.f32 %v5148_v5, %v5134_v57 }
 0x7d2   :  { %5957 = vtanh.f32 %v5153_v27  ;;  %v5152_v37 = vmul.f32 0.7978846, %v5150_v1 }
 0x7d4   :  { %5959 = vtanh.f32 %v5152_v37 }
 0x7df   :  { %v5958_v41 = vpop.eup %5957 }
 0x7e0   :  { %v5157_v2 = vadd.f32 1.0, %v5958_v41 }
 0x7e1   :  { %v5960_v46 = vpop.eup %5959 }
 0x7e2   :  { %v5156_v55 = vadd.f32 1.0, %v5960_v46  ;;  %v5159_v18 = vmul.f32 %v5157_v2, %v5143_v10 }
 0x7e4   :  { %v5158_v61 = vmul.f32 %v5156_v55, %v5142_v12 }
 0x7e6   :  { %5886 = vmatprep.mubr.msk.f32.mxu1 %vm5175_vm11, %v5158_v61 }
 0x7e7   :  { %5887 = vmatmul.mubr.msk.f32.vlgmr.msra.gmra.mxu1 %vm5175_vm11, %v5159_v18 }
 0x8a7   :  { %v5888_v44 = vpop.f32.mrf.mxu1 }
 0x8a8   :  { %v5254_v48 = vadd.f32 %v5888_v44, %v5426_v62 }
 0x8a9   :  { %v5248_v56 = vpop.f32.mrf.mxu1 }
 0x8aa   :  { %v5258_v49 = vadd.f32 %v5254_v48, %v5049_v15  ;;  %v5249_v47 = vadd.f32 %v5426_v62, %v5248_v56 }
 0x8ac   :  { %v5257_v29 = vadd.f32 %v5249_v47, %v7434_v51  ;;  %v5264_v30 = vsel %vm85_vm0, %v5258_v49, 0.0 }
 0x8ad   :  { %5265 = vadd.xlane.f32.xlu0 %v5264_v30 }
 0x8ae   :  { %v5261_v58 = vsel %vm85_vm0, %v5257_v29, 0.0 }
 0x8af   :  { %5262 = vadd.xlane.f32.xlu1 %v5261_v58 }
 0x936   :  { %v5266_v45 = vpop.xlane.xlu0 %5265 }
 0x937   :  { %v5268_v13 = vmul.f32 0.03125, %v5266_v45 }
 0x938   :  { %v5263_v7 = vpop.xlane.xlu1 %5262 }
 0x939   :  { %v5270_v24 = vsub.f32 %v5258_v49, %v5268_v13  ;;  %v5267_v11 = vmul.f32 0.03125, %v5263_v7 }
 0x93b   :  { %v5269_v9 = vsub.f32 %v5257_v29, %v5267_v11  ;;  %v5272_v21 = vmul.f32 %v5270_v24, %v5270_v24 }
 0x93d   :  { %v5276_v16 = vsel %vm85_vm0, %v5272_v21, 0.0  ;;  %v5271_v59 = vmul.f32 %v5269_v9, %v5269_v9 }
 0x93e   :  { %5277 = vadd.xlane.f32.xlu0 %v5276_v16 }
 0x93f   :  { %v5273_v36 = vsel %vm85_vm0, %v5271_v59, 0.0 }
 0x940   :  { %5274 = vadd.xlane.f32.xlu1 %v5273_v36 }
 0x9c7   :  { %v5278_v34 = vpop.xlane.xlu0 %5277 }
 0x9c8   :  { %v5280_v63 = vmul.f32 0.03125, %v5278_v34 }
 0x9c9   :  { %v5275_v40 = vpop.xlane.xlu1 %5274 }
 0x9ca   :  { %v5282_v42 = vadd.f32 1e-12, %v5280_v63  ;;  %v5279_v6 = vmul.f32 0.03125, %v5275_v40 }
 0x9cc   :  { %5961 = vrsqrt.f32 %v5282_v42  ;;  %v5281_v60 = vadd.f32 1e-12, %v5279_v6 }
 0x9ce   :  { %5963 = vrsqrt.f32 %v5281_v60 }
 0x9d9   :  { %v5962_v23 = vpop.eup %5961 }
 0x9da   :  { %v5286_v43 = vmul.f32 %v5962_v23, %v5270_v24 }
 0x9db   :  { %v5964_v8 = vpop.eup %5963 }
 0x9dc   :  { %v5285_v51 = vmul.f32 %v5964_v8, %v5269_v9  ;;  %v5292_v14 = vmul.f32 %v5429_v33, %v5286_v43 }
 0x9de   :  { %v5291_v15 = vmul.f32 %v5429_v33, %v5285_v51  ;;  %v5298_v0 = vadd.f32 %v5430_v50, %v5292_v14 }
 0x9e0   :  { %v5297_v22 = vadd.f32 %v5430_v50, %v5291_v15  ;;  %5300 = vst.msk [vmem:[#allocation2 + $0x8] sm:$0xff] %vm85_vm0, %v5298_v0 }
 0x9e2   :  { %5299 = vst.msk [vmem:[#allocation2] sm:$0xff] %vm85_vm0, %v5297_v22 }
 0x9e3   :  { %5978 = shalt.err (!%p5975_p4)
}
 0x9e4   :  { %s5997_s18 = smov 128   ;;  %s5998_s2 = smov 8  }
 0x9e5   :  { %5312 = dma.vmem_to_hbm [thread:$0]  %s5307_s22, 256, %s7504_s19, [#allocation3], %s5997_s18, %s5997_s18, %s5998_s2  }
 0x9e6   :  { %5987 = dma.done.wait [#allocation3], 256  }
 0x9e7   :  { %5988 = vsyncadd [#allocation3], 4294967040 }
 0x9e8   :  { %5316 = vsyncpa [#allocation3], 1 }

</bundles_post_ra>
